<compile_context>
chip_gen: v7x
topology: tpu7x:2x2x1
jax: 0.10.0
libtpu: 0.0.40
codegen_flags: <defaults>
</compile_context>

<pallas_src>
import functools

import jax
import jax.numpy as jnp
from jax.experimental import pallas as pl
from jax.experimental.pallas import tpu as pltpu

_VMEM_LIMIT_BYTES = 32 * 1024 * 1024      # safe on v5e/v6e (128 MiB) and v7x (64 MiB)
_VMEM_TILE_BUDGET = 20 * 1024 * 1024      # budget for the ~6 per-step blocks


def _pick_seq_tile(seq_len, vocab, emb_dim_padded, itemsize,
                   max_tile=256, budget=_VMEM_TILE_BUDGET):
    """Largest sublane-friendly tile that divides seq_len and fits the VMEM budget.

    Per-step resident VMEM ~ 2*pos + 2*out + 2*rows blocks = 6 * tile_s * E * itemsize.
    """
    for t in (512, 256, 128, 64, 32, 16, 8):
        if t > max_tile or t > seq_len or t > vocab or seq_len % t:
            continue
        if 6 * t * emb_dim_padded * itemsize <= budget:
            return t
    return seq_len  # full-dim block is always a legal BlockSpec shape


def _issue_row_gathers(tok_ref, emb_hbm, rows, sems, *, base, slot, tile_s, vocab):
    """Issue tile_s row-gather DMAs (HBM table -> rows[slot]), all on sems[slot].

    Fully unrolled so scalar address math interleaves with descriptor pushes.
    """
    for j in range(tile_s):
        tid = tok_ref[base + j]
        # PyTorch nn.Embedding raises on out-of-range ids; here we clamp so an
        # OOB id can never trigger an out-of-bounds DMA (semantic divergence).
        tid = jnp.minimum(jnp.maximum(tid, 0), vocab - 1)
        pltpu.make_async_copy(
            emb_hbm.at[pl.ds(tid, 1)],          # (1, E) row in HBM
            rows.at[slot, pl.ds(j, 1)],         # (1, E) row in VMEM scratch
            sems.at[slot],
        ).start()


def _gpt_pos_emb_kernel(tok_ref, emb_hbm, pos_ref, o_ref, rows, sems,
                        *, seq_len, tile_s, vocab, batch):
    # tok_ref : (B*S,) int32 in SMEM (scalar prefetch)
    # emb_hbm : (V, E) token-embedding table, left in HBM (pl.ANY)
    # pos_ref : (tile_s, E) positional rows for this sequence tile (revisited
    #           across the inner batch axis -> fetched once per tile)
    # o_ref   : (1, tile_s, E) output block
    # rows    : (2, tile_s, E) VMEM scratch, double-buffered gathered rows
    # sems    : (2,) DMA semaphores, one per slot
    t = pl.program_id(0)          # sequence-tile index (outer, "parallel")
    b = pl.program_id(1)          # batch index        (inner, "arbitrary")
    slot = b % 2
    row_base = t * tile_s

    # First inner step of each sequence-tile row: gather the current tile.
    @pl.when(b == 0)
    def _():
        _issue_row_gathers(tok_ref, emb_hbm, rows, sems,
                           base=row_base, slot=0,
                           tile_s=tile_s, vocab=vocab)

    # Cross-step prefetch: issue the NEXT batch element's gathers into the
    # other slot before waiting on the current one.  Its slot was fully
    # consumed (and its semaphore drained) on the previous step, so this is
    # race-free under the guaranteed sequential ("arbitrary") batch axis.
    @pl.when(b + 1 < batch)
    def _():
        _issue_row_gathers(tok_ref, emb_hbm, rows, sems,
                           base=(b + 1) * seq_len + row_base, slot=1 - slot,
                           tile_s=tile_s, vocab=vocab)

    # Single wait retiring ALL tile_s row copies of the current slot: DMA
    # semaphores count bytes, so a descriptor covering the whole (tile_s, E)
    # slab matches the sum of the individual (1, E) copies.
    pltpu.make_async_copy(emb_hbm.at[pl.ds(0, tile_s)],
                          rows.at[slot],
                          sems.at[slot]).wait()

    # Lane/sublane-dense store of the whole (tile_s, E) slab.
    o_ref[0, :, :] = (rows[slot] + pos_ref[...]).astype(o_ref.dtype)


def gpt_pos_embedding(tokens, emb_table, pos_table, *, max_seq_tile=256):
    """tokens: (B, S) int, emb_table: (V, E), pos_table: (C, E) -> (B, S, E)."""
    B, S = tokens.shape
    V, E = emb_table.shape
    C, E2 = pos_table.shape
    assert E2 == E, "emb_dim mismatch between token and positional tables"
    assert S <= C, "seq_len must not exceed context_len"

    # Lane-dense last dim: pad E up to a multiple of 128 if needed.
    E_pad = ((E + 127) // 128) * 128
    if E_pad != E:
        emb_table = jnp.pad(emb_table, ((0, 0), (0, E_pad - E)))
        pos_table = jnp.pad(pos_table, ((0, 0), (0, E_pad - E)))

    itemsize = jnp.dtype(emb_table.dtype).itemsize
    tile_s = _pick_seq_tile(S, V, E_pad, itemsize, max_tile=max_seq_tile)
    assert tile_s <= V, "tile_s must not exceed vocab (single-wait descriptor)"
    num_t = S // tile_s

    # Token ids ride the scalar path (SMEM) for DMA address generation.
    # TODO(synk): for very large B*S (>~128K tokens) switch to a per-tile
    # SMEM-blocked token input instead of whole-array scalar prefetch.
    assert B * S <= (1 << 17), "token-id scalar prefetch would overflow SMEM"
    tok_flat = tokens.reshape(B * S).astype(jnp.int32)
    pos_s = pos_table[:S]  # only the rows actually used

    kernel = functools.partial(_gpt_pos_emb_kernel,
                               seq_len=S, tile_s=tile_s, vocab=V, batch=B)

    out = pl.pallas_call(
        kernel,
        out_shape=jax.ShapeDtypeStruct((B, S, E_pad), emb_table.dtype),
        grid_spec=pltpu.PrefetchScalarGridSpec(
            num_scalar_prefetch=1,              # token ids -> SMEM
            grid=(num_t, B),                    # seq-tile outer, batch inner
            in_specs=[
                # Embedding table stays in HBM; rows are DMA-gathered in-kernel.
                pl.BlockSpec(memory_space=pl.ANY),
                # Positional rows for this sequence tile; block index depends
                # only on t, so it is revisited (not re-DMA'd) across b.
                pl.BlockSpec((tile_s, E_pad), lambda t, b, tok: (t, 0)),
            ],
            out_specs=pl.BlockSpec((1, tile_s, E_pad),
                                   lambda t, b, tok: (b, t, 0)),
            scratch_shapes=[
                pltpu.VMEM((2, tile_s, E_pad), emb_table.dtype),  # rows, 2 slots
                pltpu.SemaphoreType.DMA((2,)),                    # one sem/slot
            ],
        ),
        compiler_params=pltpu.CompilerParams(
            # Prefetched-over (batch) axis must be sequential; seq-tile axis
            # stays parallel so v7x's 2 TensorCores split the work.
            dimension_semantics=("parallel", "arbitrary"),
            vmem_limit_bytes=_VMEM_LIMIT_BYTES,
        ),
    )(tok_flat, emb_table, pos_s)

    return out if E_pad == E else out[..., :E]


if __name__ == "__main__":
    # Small shapes consistent with the module's forward:
    # vocab_size=64, context_len=16, emb_dim=128, batch=2, seq_len=8
    B, S = 2, 8
    V, C, E = 64, 16, 128

    key = jax.random.PRNGKey(0)
    k_emb, k_pos, k_tok = jax.random.split(key, 3)

    emb_table = jax.random.normal(k_emb, (V, E), dtype=jnp.float32)
    pos_table = jax.random.normal(k_pos, (C, E), dtype=jnp.float32)
    tokens = jax.random.randint(k_tok, (B, S), 0, V, dtype=jnp.int32)

    out = gpt_pos_embedding(tokens, emb_table, pos_table)
    out = jax.block_until_ready(out)

    # Pure-JAX reference of the PyTorch forward: emb(tokens) + pos_emb(arange(S))
    ref = emb_table[tokens] + pos_table[:S][None, :, :]

    assert out.shape == (B, S, E)
    assert out.dtype == jnp.float32
    assert jnp.allclose(out, ref, atol=1e-5), "mismatch vs reference"
    print("KERNEL_OK")
</pallas_src>

<mosaic_0001>
module attributes {stable_mosaic.version = 11 : i64} {
  func.func @_gpt_pos_emb_kernel(%arg0: i32, %arg1: i32, %arg2: memref<16xi32, #tpu.memory_space<smem>>, %arg3: memref<64x128xf32, #tpu.memory_space<any>>, %arg4: memref<8x128xf32, #tpu.memory_space<vmem>>, %arg5: memref<1x8x128xf32, #tpu.memory_space<vmem>>, %arg6: memref<2x8x128xf32, #tpu.memory_space<vmem>>, %arg7: memref<2x!tpu.dma_semaphore, #tpu.memory_space<semaphore_mem>>) attributes {dimension_semantics = [#tpu.dimension_semantics<parallel>, #tpu.dimension_semantics<arbitrary>], iteration_bounds = array<i64: 1, 2>, scalar_prefetch = 1 : i64, scratch_operands = 2 : i64, tpu.core_type = #tpu.core_type<tc>, window_params = [{}, {transform_indices = @transform_1, window_bounds = array<i64: 8, 128>}, {transform_indices = @transform_2, window_bounds = array<i64: 1, 8, 128>}]} {
    %c2_i32 = arith.constant 2 : i32
    %c0_i32 = arith.constant 0 : i32
    %0 = arith.cmpi eq, %c2_i32, %c0_i32 : i32
    %c1_i32 = arith.constant 1 : i32
    %1 = arith.select %0, %c1_i32, %c2_i32 : i32
    %2 = arith.remsi %arg1, %1 : i32
    %c0_i32_0 = arith.constant 0 : i32
    %3 = arith.cmpi ne, %2, %c0_i32_0 : i32
    %c0_i32_1 = arith.constant 0 : i32
    %4 = arith.cmpi slt, %2, %c0_i32_1 : i32
    %c0_i32_2 = arith.constant 0 : i32
    %5 = arith.cmpi slt, %1, %c0_i32_2 : i32
    %6 = arith.xori %4, %5 : i1
    %7 = arith.andi %6, %3 : i1
    %8 = arith.addi %2, %1 : i32
    %9 = arith.select %7, %8, %2 : i32
    %c8_i32 = arith.constant 8 : i32
    %10 = arith.muli %arg0, %c8_i32 : i32
    %c0_i32_3 = arith.constant 0 : i32
    %11 = arith.cmpi eq, %arg1, %c0_i32_3 : i32
    %12 = arith.extui %11 : i1 to i32
    %c0_i32_4 = arith.constant 0 : i32
    %13 = arith.cmpi ne, %12, %c0_i32_4 : i32
    scf.if %13 {
      %c0_i32_18 = arith.constant 0 : i32
      %31 = arith.addi %10, %c0_i32_18 : i32
      %32 = arith.index_cast %31 : i32 to index
      %33 = memref.load %arg2[%32] : memref<16xi32, #tpu.memory_space<smem>>
      %c0_i32_19 = arith.constant 0 : i32
      %34 = arith.maxsi %33, %c0_i32_19 : i32
      %c63_i32 = arith.constant 63 : i32
      %35 = arith.minsi %34, %c63_i32 : i32
      %c0_i32_20 = arith.constant 0 : i32
      %c0_i32_21 = arith.constant 0 : i32
      %c0_i32_22 = arith.constant 0 : i32
      %36 = tpu.memref_slice %arg3[%35, %c0_i32_22] : memref<64x128xf32, #tpu.memory_space<any>> -> memref<1x128xf32, #tpu.memory_space<any>>
      %c0_i32_23 = arith.constant 0 : i32
      %c0_i32_24 = arith.constant 0 : i32
      %37 = tpu.memref_slice %arg6[%c0_i32_20, %c0_i32_23, %c0_i32_24] : memref<2x8x128xf32, #tpu.memory_space<vmem>> -> memref<1x1x128xf32, #tpu.memory_space<vmem>>
      %38 = tpu.memref_squeeze %37 : memref<1x1x128xf32, #tpu.memory_space<vmem>> -> memref<1x128xf32, #tpu.memory_space<vmem>>
      %39 = tpu.memref_slice %arg7[%c0_i32_21] : memref<2x!tpu.dma_semaphore, #tpu.memory_space<semaphore_mem>> -> memref<1x!tpu.dma_semaphore, #tpu.memory_space<semaphore_mem>>
      %40 = tpu.memref_squeeze %39 : memref<1x!tpu.dma_semaphore, #tpu.memory_space<semaphore_mem>> -> memref<!tpu.dma_semaphore, #tpu.memory_space<semaphore_mem>>
      tpu.enqueue_dma source(%36 : memref<1x128xf32, #tpu.memory_space<any>>) target(%38 : memref<1x128xf32, #tpu.memory_space<vmem>>) target_semaphore(%40 : memref<!tpu.dma_semaphore, #tpu.memory_space<semaphore_mem>>)
      %c1_i32_25 = arith.constant 1 : i32
      %41 = arith.addi %10, %c1_i32_25 : i32
      %42 = arith.index_cast %41 : i32 to index
      %43 = memref.load %arg2[%42] : memref<16xi32, #tpu.memory_space<smem>>
      %c0_i32_26 = arith.constant 0 : i32
      %44 = arith.maxsi %43, %c0_i32_26 : i32
      %c63_i32_27 = arith.constant 63 : i32
      %45 = arith.minsi %44, %c63_i32_27 : i32
      %c0_i32_28 = arith.constant 0 : i32
      %c0_i32_29 = arith.constant 0 : i32
      %c0_i32_30 = arith.constant 0 : i32
      %46 = tpu.memref_slice %arg3[%45, %c0_i32_30] : memref<64x128xf32, #tpu.memory_space<any>> -> memref<1x128xf32, #tpu.memory_space<any>>
      %c1_i32_31 = arith.constant 1 : i32
      %c0_i32_32 = arith.constant 0 : i32
      %47 = tpu.memref_slice %arg6[%c0_i32_28, %c1_i32_31, %c0_i32_32] : memref<2x8x128xf32, #tpu.memory_space<vmem>> -> memref<1x1x128xf32, #tpu.memory_space<vmem>>
      %48 = tpu.memref_squeeze %47 : memref<1x1x128xf32, #tpu.memory_space<vmem>> -> memref<1x128xf32, #tpu.memory_space<vmem>>
      %49 = tpu.memref_slice %arg7[%c0_i32_29] : memref<2x!tpu.dma_semaphore, #tpu.memory_space<semaphore_mem>> -> memref<1x!tpu.dma_semaphore, #tpu.memory_space<semaphore_mem>>
      %50 = tpu.memref_squeeze %49 : memref<1x!tpu.dma_semaphore, #tpu.memory_space<semaphore_mem>> -> memref<!tpu.dma_semaphore, #tpu.memory_space<semaphore_mem>>
      tpu.enqueue_dma source(%46 : memref<1x128xf32, #tpu.memory_space<any>>) target(%48 : memref<1x128xf32, #tpu.memory_space<vmem>>) target_semaphore(%50 : memref<!tpu.dma_semaphore, #tpu.memory_space<semaphore_mem>>)
      %c2_i32_33 = arith.constant 2 : i32
      %51 = arith.addi %10, %c2_i32_33 : i32
      %52 = arith.index_cast %51 : i32 to index
      %53 = memref.load %arg2[%52] : memref<16xi32, #tpu.memory_space<smem>>
      %c0_i32_34 = arith.constant 0 : i32
      %54 = arith.maxsi %53, %c0_i32_34 : i32
      %c63_i32_35 = arith.constant 63 : i32
      %55 = arith.minsi %54, %c63_i32_35 : i32
      %c0_i32_36 = arith.constant 0 : i32
      %c0_i32_37 = arith.constant 0 : i32
      %c0_i32_38 = arith.constant 0 : i32
      %56 = tpu.memref_slice %arg3[%55, %c0_i32_38] : memref<64x128xf32, #tpu.memory_space<any>> -> memref<1x128xf32, #tpu.memory_space<any>>
      %c2_i32_39 = arith.constant 2 : i32
      %c0_i32_40 = arith.constant 0 : i32
      %57 = tpu.memref_slice %arg6[%c0_i32_36, %c2_i32_39, %c0_i32_40] : memref<2x8x128xf32, #tpu.memory_space<vmem>> -> memref<1x1x128xf32, #tpu.memory_space<vmem>>
      %58 = tpu.memref_squeeze %57 : memref<1x1x128xf32, #tpu.memory_space<vmem>> -> memref<1x128xf32, #tpu.memory_space<vmem>>
      %59 = tpu.memref_slice %arg7[%c0_i32_37] : memref<2x!tpu.dma_semaphore, #tpu.memory_space<semaphore_mem>> -> memref<1x!tpu.dma_semaphore, #tpu.memory_space<semaphore_mem>>
      %60 = tpu.memref_squeeze %59 : memref<1x!tpu.dma_semaphore, #tpu.memory_space<semaphore_mem>> -> memref<!tpu.dma_semaphore, #tpu.memory_space<semaphore_mem>>
      tpu.enqueue_dma source(%56 : memref<1x128xf32, #tpu.memory_space<any>>) target(%58 : memref<1x128xf32, #tpu.memory_space<vmem>>) target_semaphore(%60 : memref<!tpu.dma_semaphore, #tpu.memory_space<semaphore_mem>>)
      %c3_i32 = arith.constant 3 : i32
      %61 = arith.addi %10, %c3_i32 : i32
      %62 = arith.index_cast %61 : i32 to index
      %63 = memref.load %arg2[%62] : memref<16xi32, #tpu.memory_space<smem>>
      %c0_i32_41 = arith.constant 0 : i32
      %64 = arith.maxsi %63, %c0_i32_41 : i32
      %c63_i32_42 = arith.constant 63 : i32
      %65 = arith.minsi %64, %c63_i32_42 : i32
      %c0_i32_43 = arith.constant 0 : i32
      %c0_i32_44 = arith.constant 0 : i32
      %c0_i32_45 = arith.constant 0 : i32
      %66 = tpu.memref_slice %arg3[%65, %c0_i32_45] : memref<64x128xf32, #tpu.memory_space<any>> -> memref<1x128xf32, #tpu.memory_space<any>>
      %c3_i32_46 = arith.constant 3 : i32
      %c0_i32_47 = arith.constant 0 : i32
      %67 = tpu.memref_slice %arg6[%c0_i32_43, %c3_i32_46, %c0_i32_47] : memref<2x8x128xf32, #tpu.memory_space<vmem>> -> memref<1x1x128xf32, #tpu.memory_space<vmem>>
      %68 = tpu.memref_squeeze %67 : memref<1x1x128xf32, #tpu.memory_space<vmem>> -> memref<1x128xf32, #tpu.memory_space<vmem>>
      %69 = tpu.memref_slice %arg7[%c0_i32_44] : memref<2x!tpu.dma_semaphore, #tpu.memory_space<semaphore_mem>> -> memref<1x!tpu.dma_semaphore, #tpu.memory_space<semaphore_mem>>
      %70 = tpu.memref_squeeze %69 : memref<1x!tpu.dma_semaphore, #tpu.memory_space<semaphore_mem>> -> memref<!tpu.dma_semaphore, #tpu.memory_space<semaphore_mem>>
      tpu.enqueue_dma source(%66 : memref<1x128xf32, #tpu.memory_space<any>>) target(%68 : memref<1x128xf32, #tpu.memory_space<vmem>>) target_semaphore(%70 : memref<!tpu.dma_semaphore, #tpu.memory_space<semaphore_mem>>)
      %c4_i32 = arith.constant 4 : i32
      %71 = arith.addi %10, %c4_i32 : i32
      %72 = arith.index_cast %71 : i32 to index
      %73 = memref.load %arg2[%72] : memref<16xi32, #tpu.memory_space<smem>>
      %c0_i32_48 = arith.constant 0 : i32
      %74 = arith.maxsi %73, %c0_i32_48 : i32
      %c63_i32_49 = arith.constant 63 : i32
      %75 = arith.minsi %74, %c63_i32_49 : i32
      %c0_i32_50 = arith.constant 0 : i32
      %c0_i32_51 = arith.constant 0 : i32
      %c0_i32_52 = arith.constant 0 : i32
      %76 = tpu.memref_slice %arg3[%75, %c0_i32_52] : memref<64x128xf32, #tpu.memory_space<any>> -> memref<1x128xf32, #tpu.memory_space<any>>
      %c4_i32_53 = arith.constant 4 : i32
      %c0_i32_54 = arith.constant 0 : i32
      %77 = tpu.memref_slice %arg6[%c0_i32_50, %c4_i32_53, %c0_i32_54] : memref<2x8x128xf32, #tpu.memory_space<vmem>> -> memref<1x1x128xf32, #tpu.memory_space<vmem>>
      %78 = tpu.memref_squeeze %77 : memref<1x1x128xf32, #tpu.memory_space<vmem>> -> memref<1x128xf32, #tpu.memory_space<vmem>>
      %79 = tpu.memref_slice %arg7[%c0_i32_51] : memref<2x!tpu.dma_semaphore, #tpu.memory_space<semaphore_mem>> -> memref<1x!tpu.dma_semaphore, #tpu.memory_space<semaphore_mem>>
      %80 = tpu.memref_squeeze %79 : memref<1x!tpu.dma_semaphore, #tpu.memory_space<semaphore_mem>> -> memref<!tpu.dma_semaphore, #tpu.memory_space<semaphore_mem>>
      tpu.enqueue_dma source(%76 : memref<1x128xf32, #tpu.memory_space<any>>) target(%78 : memref<1x128xf32, #tpu.memory_space<vmem>>) target_semaphore(%80 : memref<!tpu.dma_semaphore, #tpu.memory_space<semaphore_mem>>)
      %c5_i32 = arith.constant 5 : i32
      %81 = arith.addi %10, %c5_i32 : i32
      %82 = arith.index_cast %81 : i32 to index
      %83 = memref.load %arg2[%82] : memref<16xi32, #tpu.memory_space<smem>>
      %c0_i32_55 = arith.constant 0 : i32
      %84 = arith.maxsi %83, %c0_i32_55 : i32
      %c63_i32_56 = arith.constant 63 : i32
      %85 = arith.minsi %84, %c63_i32_56 : i32
      %c0_i32_57 = arith.constant 0 : i32
      %c0_i32_58 = arith.constant 0 : i32
      %c0_i32_59 = arith.constant 0 : i32
      %86 = tpu.memref_slice %arg3[%85, %c0_i32_59] : memref<64x128xf32, #tpu.memory_space<any>> -> memref<1x128xf32, #tpu.memory_space<any>>
      %c5_i32_60 = arith.constant 5 : i32
      %c0_i32_61 = arith.constant 0 : i32
      %87 = tpu.memref_slice %arg6[%c0_i32_57, %c5_i32_60, %c0_i32_61] : memref<2x8x128xf32, #tpu.memory_space<vmem>> -> memref<1x1x128xf32, #tpu.memory_space<vmem>>
      %88 = tpu.memref_squeeze %87 : memref<1x1x128xf32, #tpu.memory_space<vmem>> -> memref<1x128xf32, #tpu.memory_space<vmem>>
      %89 = tpu.memref_slice %arg7[%c0_i32_58] : memref<2x!tpu.dma_semaphore, #tpu.memory_space<semaphore_mem>> -> memref<1x!tpu.dma_semaphore, #tpu.memory_space<semaphore_mem>>
      %90 = tpu.memref_squeeze %89 : memref<1x!tpu.dma_semaphore, #tpu.memory_space<semaphore_mem>> -> memref<!tpu.dma_semaphore, #tpu.memory_space<semaphore_mem>>
      tpu.enqueue_dma source(%86 : memref<1x128xf32, #tpu.memory_space<any>>) target(%88 : memref<1x128xf32, #tpu.memory_space<vmem>>) target_semaphore(%90 : memref<!tpu.dma_semaphore, #tpu.memory_space<semaphore_mem>>)
      %c6_i32 = arith.constant 6 : i32
      %91 = arith.addi %10, %c6_i32 : i32
      %92 = arith.index_cast %91 : i32 to index
      %93 = memref.load %arg2[%92] : memref<16xi32, #tpu.memory_space<smem>>
      %c0_i32_62 = arith.constant 0 : i32
      %94 = arith.maxsi %93, %c0_i32_62 : i32
      %c63_i32_63 = arith.constant 63 : i32
      %95 = arith.minsi %94, %c63_i32_63 : i32
      %c0_i32_64 = arith.constant 0 : i32
      %c0_i32_65 = arith.constant 0 : i32
      %c0_i32_66 = arith.constant 0 : i32
      %96 = tpu.memref_slice %arg3[%95, %c0_i32_66] : memref<64x128xf32, #tpu.memory_space<any>> -> memref<1x128xf32, #tpu.memory_space<any>>
      %c6_i32_67 = arith.constant 6 : i32
      %c0_i32_68 = arith.constant 0 : i32
      %97 = tpu.memref_slice %arg6[%c0_i32_64, %c6_i32_67, %c0_i32_68] : memref<2x8x128xf32, #tpu.memory_space<vmem>> -> memref<1x1x128xf32, #tpu.memory_space<vmem>>
      %98 = tpu.memref_squeeze %97 : memref<1x1x128xf32, #tpu.memory_space<vmem>> -> memref<1x128xf32, #tpu.memory_space<vmem>>
      %99 = tpu.memref_slice %arg7[%c0_i32_65] : memref<2x!tpu.dma_semaphore, #tpu.memory_space<semaphore_mem>> -> memref<1x!tpu.dma_semaphore, #tpu.memory_space<semaphore_mem>>
      %100 = tpu.memref_squeeze %99 : memref<1x!tpu.dma_semaphore, #tpu.memory_space<semaphore_mem>> -> memref<!tpu.dma_semaphore, #tpu.memory_space<semaphore_mem>>
      tpu.enqueue_dma source(%96 : memref<1x128xf32, #tpu.memory_space<any>>) target(%98 : memref<1x128xf32, #tpu.memory_space<vmem>>) target_semaphore(%100 : memref<!tpu.dma_semaphore, #tpu.memory_space<semaphore_mem>>)
      %c7_i32 = arith.constant 7 : i32
      %101 = arith.addi %10, %c7_i32 : i32
      %102 = arith.index_cast %101 : i32 to index
      %103 = memref.load %arg2[%102] : memref<16xi32, #tpu.memory_space<smem>>
      %c0_i32_69 = arith.constant 0 : i32
      %104 = arith.maxsi %103, %c0_i32_69 : i32
      %c63_i32_70 = arith.constant 63 : i32
      %105 = arith.minsi %104, %c63_i32_70 : i32
      %c0_i32_71 = arith.constant 0 : i32
      %c0_i32_72 = arith.constant 0 : i32
      %c0_i32_73 = arith.constant 0 : i32
      %106 = tpu.memref_slice %arg3[%105, %c0_i32_73] : memref<64x128xf32, #tpu.memory_space<any>> -> memref<1x128xf32, #tpu.memory_space<any>>
      %c7_i32_74 = arith.constant 7 : i32
      %c0_i32_75 = arith.constant 0 : i32
      %107 = tpu.memref_slice %arg6[%c0_i32_71, %c7_i32_74, %c0_i32_75] : memref<2x8x128xf32, #tpu.memory_space<vmem>> -> memref<1x1x128xf32, #tpu.memory_space<vmem>>
      %108 = tpu.memref_squeeze %107 : memref<1x1x128xf32, #tpu.memory_space<vmem>> -> memref<1x128xf32, #tpu.memory_space<vmem>>
      %109 = tpu.memref_slice %arg7[%c0_i32_72] : memref<2x!tpu.dma_semaphore, #tpu.memory_space<semaphore_mem>> -> memref<1x!tpu.dma_semaphore, #tpu.memory_space<semaphore_mem>>
      %110 = tpu.memref_squeeze %109 : memref<1x!tpu.dma_semaphore, #tpu.memory_space<semaphore_mem>> -> memref<!tpu.dma_semaphore, #tpu.memory_space<semaphore_mem>>
      tpu.enqueue_dma source(%106 : memref<1x128xf32, #tpu.memory_space<any>>) target(%108 : memref<1x128xf32, #tpu.memory_space<vmem>>) target_semaphore(%110 : memref<!tpu.dma_semaphore, #tpu.memory_space<semaphore_mem>>)
    } else {
    }
    %c1_i32_5 = arith.constant 1 : i32
    %14 = arith.addi %arg1, %c1_i32_5 : i32
    %c2_i32_6 = arith.constant 2 : i32
    %15 = arith.cmpi slt, %14, %c2_i32_6 : i32
    %16 = arith.extui %15 : i1 to i32
    %c0_i32_7 = arith.constant 0 : i32
    %17 = arith.cmpi ne, %16, %c0_i32_7 : i32
    scf.if %17 {
      %c1_i32_18 = arith.constant 1 : i32
      %31 = arith.addi %arg1, %c1_i32_18 : i32
      %c8_i32_19 = arith.constant 8 : i32
      %32 = arith.muli %31, %c8_i32_19 : i32
      %33 = arith.addi %32, %10 : i32
      %c1_i32_20 = arith.constant 1 : i32
      %34 = arith.subi %c1_i32_20, %9 : i32
      %c0_i32_21 = arith.constant 0 : i32
      %35 = arith.addi %33, %c0_i32_21 : i32
      %36 = arith.index_cast %35 : i32 to index
      %37 = memref.load %arg2[%36] : memref<16xi32, #tpu.memory_space<smem>>
      %c0_i32_22 = arith.constant 0 : i32
      %38 = arith.maxsi %37, %c0_i32_22 : i32
      %c63_i32 = arith.constant 63 : i32
      %39 = arith.minsi %38, %c63_i32 : i32
      %c0_i32_23 = arith.constant 0 : i32
      %40 = tpu.memref_slice %arg3[%39, %c0_i32_23] : memref<64x128xf32, #tpu.memory_space<any>> -> memref<1x128xf32, #tpu.memory_space<any>>
      %c0_i32_24 = arith.constant 0 : i32
      %c0_i32_25 = arith.constant 0 : i32
      %41 = tpu.memref_slice %arg6[%34, %c0_i32_24, %c0_i32_25] : memref<2x8x128xf32, #tpu.memory_space<vmem>> -> memref<1x1x128xf32, #tpu.memory_space<vmem>>
      %42 = tpu.memref_squeeze %41 : memref<1x1x128xf32, #tpu.memory_space<vmem>> -> memref<1x128xf32, #tpu.memory_space<vmem>>
      %43 = tpu.memref_slice %arg7[%34] : memref<2x!tpu.dma_semaphore, #tpu.memory_space<semaphore_mem>> -> memref<1x!tpu.dma_semaphore, #tpu.memory_space<semaphore_mem>>
      %44 = tpu.memref_squeeze %43 : memref<1x!tpu.dma_semaphore, #tpu.memory_space<semaphore_mem>> -> memref<!tpu.dma_semaphore, #tpu.memory_space<semaphore_mem>>
      tpu.enqueue_dma source(%40 : memref<1x128xf32, #tpu.memory_space<any>>) target(%42 : memref<1x128xf32, #tpu.memory_space<vmem>>) target_semaphore(%44 : memref<!tpu.dma_semaphore, #tpu.memory_space<semaphore_mem>>)
      %c1_i32_26 = arith.constant 1 : i32
      %45 = arith.addi %33, %c1_i32_26 : i32
      %46 = arith.index_cast %45 : i32 to index
      %47 = memref.load %arg2[%46] : memref<16xi32, #tpu.memory_space<smem>>
      %c0_i32_27 = arith.constant 0 : i32
      %48 = arith.maxsi %47, %c0_i32_27 : i32
      %c63_i32_28 = arith.constant 63 : i32
      %49 = arith.minsi %48, %c63_i32_28 : i32
      %c0_i32_29 = arith.constant 0 : i32
      %50 = tpu.memref_slice %arg3[%49, %c0_i32_29] : memref<64x128xf32, #tpu.memory_space<any>> -> memref<1x128xf32, #tpu.memory_space<any>>
      %c1_i32_30 = arith.constant 1 : i32
      %c0_i32_31 = arith.constant 0 : i32
      %51 = tpu.memref_slice %arg6[%34, %c1_i32_30, %c0_i32_31] : memref<2x8x128xf32, #tpu.memory_space<vmem>> -> memref<1x1x128xf32, #tpu.memory_space<vmem>>
      %52 = tpu.memref_squeeze %51 : memref<1x1x128xf32, #tpu.memory_space<vmem>> -> memref<1x128xf32, #tpu.memory_space<vmem>>
      %53 = tpu.memref_slice %arg7[%34] : memref<2x!tpu.dma_semaphore, #tpu.memory_space<semaphore_mem>> -> memref<1x!tpu.dma_semaphore, #tpu.memory_space<semaphore_mem>>
      %54 = tpu.memref_squeeze %53 : memref<1x!tpu.dma_semaphore, #tpu.memory_space<semaphore_mem>> -> memref<!tpu.dma_semaphore, #tpu.memory_space<semaphore_mem>>
      tpu.enqueue_dma source(%50 : memref<1x128xf32, #tpu.memory_space<any>>) target(%52 : memref<1x128xf32, #tpu.memory_space<vmem>>) target_semaphore(%54 : memref<!tpu.dma_semaphore, #tpu.memory_space<semaphore_mem>>)
      %c2_i32_32 = arith.constant 2 : i32
      %55 = arith.addi %33, %c2_i32_32 : i32
      %56 = arith.index_cast %55 : i32 to index
      %57 = memref.load %arg2[%56] : memref<16xi32, #tpu.memory_space<smem>>
      %c0_i32_33 = arith.constant 0 : i32
      %58 = arith.maxsi %57, %c0_i32_33 : i32
      %c63_i32_34 = arith.constant 63 : i32
      %59 = arith.minsi %58, %c63_i32_34 : i32
      %c0_i32_35 = arith.constant 0 : i32
      %60 = tpu.memref_slice %arg3[%59, %c0_i32_35] : memref<64x128xf32, #tpu.memory_space<any>> -> memref<1x128xf32, #tpu.memory_space<any>>
      %c2_i32_36 = arith.constant 2 : i32
      %c0_i32_37 = arith.constant 0 : i32
      %61 = tpu.memref_slice %arg6[%34, %c2_i32_36, %c0_i32_37] : memref<2x8x128xf32, #tpu.memory_space<vmem>> -> memref<1x1x128xf32, #tpu.memory_space<vmem>>
      %62 = tpu.memref_squeeze %61 : memref<1x1x128xf32, #tpu.memory_space<vmem>> -> memref<1x128xf32, #tpu.memory_space<vmem>>
      %63 = tpu.memref_slice %arg7[%34] : memref<2x!tpu.dma_semaphore, #tpu.memory_space<semaphore_mem>> -> memref<1x!tpu.dma_semaphore, #tpu.memory_space<semaphore_mem>>
      %64 = tpu.memref_squeeze %63 : memref<1x!tpu.dma_semaphore, #tpu.memory_space<semaphore_mem>> -> memref<!tpu.dma_semaphore, #tpu.memory_space<semaphore_mem>>
      tpu.enqueue_dma source(%60 : memref<1x128xf32, #tpu.memory_space<any>>) target(%62 : memref<1x128xf32, #tpu.memory_space<vmem>>) target_semaphore(%64 : memref<!tpu.dma_semaphore, #tpu.memory_space<semaphore_mem>>)
      %c3_i32 = arith.constant 3 : i32
      %65 = arith.addi %33, %c3_i32 : i32
      %66 = arith.index_cast %65 : i32 to index
      %67 = memref.load %arg2[%66] : memref<16xi32, #tpu.memory_space<smem>>
      %c0_i32_38 = arith.constant 0 : i32
      %68 = arith.maxsi %67, %c0_i32_38 : i32
      %c63_i32_39 = arith.constant 63 : i32
      %69 = arith.minsi %68, %c63_i32_39 : i32
      %c0_i32_40 = arith.constant 0 : i32
      %70 = tpu.memref_slice %arg3[%69, %c0_i32_40] : memref<64x128xf32, #tpu.memory_space<any>> -> memref<1x128xf32, #tpu.memory_space<any>>
      %c3_i32_41 = arith.constant 3 : i32
      %c0_i32_42 = arith.constant 0 : i32
      %71 = tpu.memref_slice %arg6[%34, %c3_i32_41, %c0_i32_42] : memref<2x8x128xf32, #tpu.memory_space<vmem>> -> memref<1x1x128xf32, #tpu.memory_space<vmem>>
      %72 = tpu.memref_squeeze %71 : memref<1x1x128xf32, #tpu.memory_space<vmem>> -> memref<1x128xf32, #tpu.memory_space<vmem>>
      %73 = tpu.memref_slice %arg7[%34] : memref<2x!tpu.dma_semaphore, #tpu.memory_space<semaphore_mem>> -> memref<1x!tpu.dma_semaphore, #tpu.memory_space<semaphore_mem>>
      %74 = tpu.memref_squeeze %73 : memref<1x!tpu.dma_semaphore, #tpu.memory_space<semaphore_mem>> -> memref<!tpu.dma_semaphore, #tpu.memory_space<semaphore_mem>>
      tpu.enqueue_dma source(%70 : memref<1x128xf32, #tpu.memory_space<any>>) target(%72 : memref<1x128xf32, #tpu.memory_space<vmem>>) target_semaphore(%74 : memref<!tpu.dma_semaphore, #tpu.memory_space<semaphore_mem>>)
      %c4_i32 = arith.constant 4 : i32
      %75 = arith.addi %33, %c4_i32 : i32
      %76 = arith.index_cast %75 : i32 to index
      %77 = memref.load %arg2[%76] : memref<16xi32, #tpu.memory_space<smem>>
      %c0_i32_43 = arith.constant 0 : i32
      %78 = arith.maxsi %77, %c0_i32_43 : i32
      %c63_i32_44 = arith.constant 63 : i32
      %79 = arith.minsi %78, %c63_i32_44 : i32
      %c0_i32_45 = arith.constant 0 : i32
      %80 = tpu.memref_slice %arg3[%79, %c0_i32_45] : memref<64x128xf32, #tpu.memory_space<any>> -> memref<1x128xf32, #tpu.memory_space<any>>
      %c4_i32_46 = arith.constant 4 : i32
      %c0_i32_47 = arith.constant 0 : i32
      %81 = tpu.memref_slice %arg6[%34, %c4_i32_46, %c0_i32_47] : memref<2x8x128xf32, #tpu.memory_space<vmem>> -> memref<1x1x128xf32, #tpu.memory_space<vmem>>
      %82 = tpu.memref_squeeze %81 : memref<1x1x128xf32, #tpu.memory_space<vmem>> -> memref<1x128xf32, #tpu.memory_space<vmem>>
      %83 = tpu.memref_slice %arg7[%34] : memref<2x!tpu.dma_semaphore, #tpu.memory_space<semaphore_mem>> -> memref<1x!tpu.dma_semaphore, #tpu.memory_space<semaphore_mem>>
      %84 = tpu.memref_squeeze %83 : memref<1x!tpu.dma_semaphore, #tpu.memory_space<semaphore_mem>> -> memref<!tpu.dma_semaphore, #tpu.memory_space<semaphore_mem>>
      tpu.enqueue_dma source(%80 : memref<1x128xf32, #tpu.memory_space<any>>) target(%82 : memref<1x128xf32, #tpu.memory_space<vmem>>) target_semaphore(%84 : memref<!tpu.dma_semaphore, #tpu.memory_space<semaphore_mem>>)
      %c5_i32 = arith.constant 5 : i32
      %85 = arith.addi %33, %c5_i32 : i32
      %86 = arith.index_cast %85 : i32 to index
      %87 = memref.load %arg2[%86] : memref<16xi32, #tpu.memory_space<smem>>
      %c0_i32_48 = arith.constant 0 : i32
      %88 = arith.maxsi %87, %c0_i32_48 : i32
      %c63_i32_49 = arith.constant 63 : i32
      %89 = arith.minsi %88, %c63_i32_49 : i32
      %c0_i32_50 = arith.constant 0 : i32
      %90 = tpu.memref_slice %arg3[%89, %c0_i32_50] : memref<64x128xf32, #tpu.memory_space<any>> -> memref<1x128xf32, #tpu.memory_space<any>>
      %c5_i32_51 = arith.constant 5 : i32
      %c0_i32_52 = arith.constant 0 : i32
      %91 = tpu.memref_slice %arg6[%34, %c5_i32_51, %c0_i32_52] : memref<2x8x128xf32, #tpu.memory_space<vmem>> -> memref<1x1x128xf32, #tpu.memory_space<vmem>>
      %92 = tpu.memref_squeeze %91 : memref<1x1x128xf32, #tpu.memory_space<vmem>> -> memref<1x128xf32, #tpu.memory_space<vmem>>
      %93 = tpu.memref_slice %arg7[%34] : memref<2x!tpu.dma_semaphore, #tpu.memory_space<semaphore_mem>> -> memref<1x!tpu.dma_semaphore, #tpu.memory_space<semaphore_mem>>
      %94 = tpu.memref_squeeze %93 : memref<1x!tpu.dma_semaphore, #tpu.memory_space<semaphore_mem>> -> memref<!tpu.dma_semaphore, #tpu.memory_space<semaphore_mem>>
      tpu.enqueue_dma source(%90 : memref<1x128xf32, #tpu.memory_space<any>>) target(%92 : memref<1x128xf32, #tpu.memory_space<vmem>>) target_semaphore(%94 : memref<!tpu.dma_semaphore, #tpu.memory_space<semaphore_mem>>)
      %c6_i32 = arith.constant 6 : i32
      %95 = arith.addi %33, %c6_i32 : i32
      %96 = arith.index_cast %95 : i32 to index
      %97 = memref.load %arg2[%96] : memref<16xi32, #tpu.memory_space<smem>>
      %c0_i32_53 = arith.constant 0 : i32
      %98 = arith.maxsi %97, %c0_i32_53 : i32
      %c63_i32_54 = arith.constant 63 : i32
      %99 = arith.minsi %98, %c63_i32_54 : i32
      %c0_i32_55 = arith.constant 0 : i32
      %100 = tpu.memref_slice %arg3[%99, %c0_i32_55] : memref<64x128xf32, #tpu.memory_space<any>> -> memref<1x128xf32, #tpu.memory_space<any>>
      %c6_i32_56 = arith.constant 6 : i32
      %c0_i32_57 = arith.constant 0 : i32
      %101 = tpu.memref_slice %arg6[%34, %c6_i32_56, %c0_i32_57] : memref<2x8x128xf32, #tpu.memory_space<vmem>> -> memref<1x1x128xf32, #tpu.memory_space<vmem>>
      %102 = tpu.memref_squeeze %101 : memref<1x1x128xf32, #tpu.memory_space<vmem>> -> memref<1x128xf32, #tpu.memory_space<vmem>>
      %103 = tpu.memref_slice %arg7[%34] : memref<2x!tpu.dma_semaphore, #tpu.memory_space<semaphore_mem>> -> memref<1x!tpu.dma_semaphore, #tpu.memory_space<semaphore_mem>>
      %104 = tpu.memref_squeeze %103 : memref<1x!tpu.dma_semaphore, #tpu.memory_space<semaphore_mem>> -> memref<!tpu.dma_semaphore, #tpu.memory_space<semaphore_mem>>
      tpu.enqueue_dma source(%100 : memref<1x128xf32, #tpu.memory_space<any>>) target(%102 : memref<1x128xf32, #tpu.memory_space<vmem>>) target_semaphore(%104 : memref<!tpu.dma_semaphore, #tpu.memory_space<semaphore_mem>>)
      %c7_i32 = arith.constant 7 : i32
      %105 = arith.addi %33, %c7_i32 : i32
      %106 = arith.index_cast %105 : i32 to index
      %107 = memref.load %arg2[%106] : memref<16xi32, #tpu.memory_space<smem>>
      %c0_i32_58 = arith.constant 0 : i32
      %108 = arith.maxsi %107, %c0_i32_58 : i32
      %c63_i32_59 = arith.constant 63 : i32
      %109 = arith.minsi %108, %c63_i32_59 : i32
      %c0_i32_60 = arith.constant 0 : i32
      %110 = tpu.memref_slice %arg3[%109, %c0_i32_60] : memref<64x128xf32, #tpu.memory_space<any>> -> memref<1x128xf32, #tpu.memory_space<any>>
      %c7_i32_61 = arith.constant 7 : i32
      %c0_i32_62 = arith.constant 0 : i32
      %111 = tpu.memref_slice %arg6[%34, %c7_i32_61, %c0_i32_62] : memref<2x8x128xf32, #tpu.memory_space<vmem>> -> memref<1x1x128xf32, #tpu.memory_space<vmem>>
      %112 = tpu.memref_squeeze %111 : memref<1x1x128xf32, #tpu.memory_space<vmem>> -> memref<1x128xf32, #tpu.memory_space<vmem>>
      %113 = tpu.memref_slice %arg7[%34] : memref<2x!tpu.dma_semaphore, #tpu.memory_space<semaphore_mem>> -> memref<1x!tpu.dma_semaphore, #tpu.memory_space<semaphore_mem>>
      %114 = tpu.memref_squeeze %113 : memref<1x!tpu.dma_semaphore, #tpu.memory_space<semaphore_mem>> -> memref<!tpu.dma_semaphore, #tpu.memory_space<semaphore_mem>>
      tpu.enqueue_dma source(%110 : memref<1x128xf32, #tpu.memory_space<any>>) target(%112 : memref<1x128xf32, #tpu.memory_space<vmem>>) target_semaphore(%114 : memref<!tpu.dma_semaphore, #tpu.memory_space<semaphore_mem>>)
    } else {
    }
    %c0_i32_8 = arith.constant 0 : i32
    %c0_i32_9 = arith.constant 0 : i32
    %18 = tpu.memref_slice %arg3[%c0_i32_8, %c0_i32_9] : memref<64x128xf32, #tpu.memory_space<any>> -> memref<8x128xf32, #tpu.memory_space<any>>
    %c0_i32_10 = arith.constant 0 : i32
    %c0_i32_11 = arith.constant 0 : i32
    %19 = tpu.memref_slice %arg6[%9, %c0_i32_10, %c0_i32_11] : memref<2x8x128xf32, #tpu.memory_space<vmem>> -> memref<1x8x128xf32, #tpu.memory_space<vmem>>
    %20 = tpu.memref_squeeze %19 : memref<1x8x128xf32, #tpu.memory_space<vmem>> -> memref<8x128xf32, #tpu.memory_space<vmem>>
    %21 = tpu.memref_slice %arg7[%9] : memref<2x!tpu.dma_semaphore, #tpu.memory_space<semaphore_mem>> -> memref<1x!tpu.dma_semaphore, #tpu.memory_space<semaphore_mem>>
    %22 = tpu.memref_squeeze %21 : memref<1x!tpu.dma_semaphore, #tpu.memory_space<semaphore_mem>> -> memref<!tpu.dma_semaphore, #tpu.memory_space<semaphore_mem>>
    tpu.wait_dma2 semaphore(%22 : memref<!tpu.dma_semaphore, #tpu.memory_space<semaphore_mem>>) src(%18 : memref<8x128xf32, #tpu.memory_space<any>>) dst(%20 : memref<8x128xf32, #tpu.memory_space<vmem>>)
    %23 = arith.index_cast %9 : i32 to index
    %c0 = arith.constant 0 : index
    %c0_12 = arith.constant 0 : index
    %24 = vector.load %arg6[%23, %c0, %c0_12] : memref<2x8x128xf32, #tpu.memory_space<vmem>>, vector<1x8x128xf32>
    %25 = vector.shape_cast %24 : vector<1x8x128xf32> to vector<8x128xf32>
    %c0_13 = arith.constant 0 : index
    %c0_14 = arith.constant 0 : index
    %26 = vector.load %arg4[%c0_13, %c0_14] : memref<8x128xf32, #tpu.memory_space<vmem>>, vector<8x128xf32>
    %27 = arith.addf %25, %26 : vector<8x128xf32>
    %c0_15 = arith.constant 0 : index
    %c0_16 = arith.constant 0 : index
    %c0_17 = arith.constant 0 : index
    %28 = vector.load %arg5[%c0_15, %c0_16, %c0_17] : memref<1x8x128xf32, #tpu.memory_space<vmem>>, vector<1x8x128xf32>
    %29 = vector.shape_cast %28 : vector<1x8x128xf32> to vector<8x128xf32>
    %30 = vector.shape_cast %27 : vector<8x128xf32> to vector<1x8x128xf32>
    tpu.vector_store %arg5[%c0_15, %c0_16, %c0_17], %30 {strides = array<i32>} : memref<1x8x128xf32, #tpu.memory_space<vmem>>, vector<1x8x128xf32>,
    return
  }
  func.func @transform_1(%arg0: i32, %arg1: i32, %arg2: memref<16xi32, #tpu.memory_space<smem>>) -> (i32, i32) {
    %c0_i32 = arith.constant 0 : i32
    %c0_i32_0 = arith.constant 0 : i32
    return %arg0, %c0_i32 : i32, i32
  }
  func.func @transform_2(%arg0: i32, %arg1: i32, %arg2: memref<16xi32, #tpu.memory_space<smem>>) -> (i32, i32, i32) {
    %c0_i32 = arith.constant 0 : i32
    %c0_i32_0 = arith.constant 0 : i32
    return %arg1, %arg0, %c0_i32 : i32, i32, i32
  }
}

</mosaic_0001>

<bundles_post_ra>
// kernel: tpu_custom_call.1
= control target key start
LH: loop header
LB: loop body
LE: loop exit
PB: predicated region body
PF: predicated region fallthrough
CT: control target
= control target key end

     0   :  { %s2197_s0 = inlined_call_operand.hbm [shape: s32[16], index: 0, kind: input, shape index: {}]   ;;  %s2198_s1 = inlined_call_operand.hbm [shape: f32[64,128], index: 1, kind: input, shape index: {}]   ;;  %s2199_s2 = inlined_call_operand.hbm [shape: f32[8,128], index: 2, kind: input, shape index: {}]   ;;  %s2200_s3 = inlined_call_operand.hbm [shape: f32[2,8,128], index: 3, kind: output, shape index: {}]  }
   0x1   :  { %2212 = sst [smem:[#allocation62_spill]] %s2199_s2  ;;  %s929_s14 = scalar_lea.hbm %s2197_s0, 16 }
   0x2   :  { %p930_p0 = scmp.ne.s32.totalorder %s2197_s0, %s929_s14  ;;  %p933_p1 = scmp.lt.u32.totalorder %s929_s14, %s2197_s0 }
   0x4   :  { %p935_p2 = pnand %p933_p1, %p930_p0 }
   0x6   :  { %938 = shalt.err (!%p935_p2)  }
   0x7   :  { %s1503_s19 = smov [#allocation5]  }
   0x8   :  { %9 = dma.hbm_to_smem %s2197_s0, 16, %s1503_s19, [#allocation4] }
   0x9   :  { %1467 = dma.done.wait [#allocation4], 16 }
   0xa   :  { %1468 = vsyncadd [#allocation4], 4294967280 }
   0xb   :  { %11 = sfence }
   0xc   :  { %12 = vsyncpa [#allocation7], 0 }
   0xd   :  { %13 = vsyncpa [#allocation8], 0 }
   0xe   :  { %15 = vsyncpa [#allocation8 + $0x1], 0  ;;  %s1546_s22 = smov 0   ;;  %s1548_s23 = smov 0  }
   0xf   :  { %s1550_s24 = smov 0   ;;  %s1552_s25 = smov 0  }
  0x10   :  { %s1554_s26 = smov 0   ;;  %s1556_s27 = smov 0  }
  0x11 LB: > { %2213 = sst [smem:[#allocation56_spill]] %s1481_s22  ;;  %s653_s0 = sadd.s32 4294967295, %s1501_s27   ;;  %s1501_s27 = sphi %s1556_s27, %s21_s27   ;;  %s1497_s26 = sphi %s1554_s26, %s2249_s26   ;;  %s1493_s25 = sphi %s1552_s25, %s2248_s25   ;;  %s1489_s24 = sphi %s1550_s24, %s2247_s24   ;;  %s1485_s23 = sphi %s1548_s23, %s2251_s23   ;;  %s1481_s22 = sphi %s1546_s22, %s2250_s22  }
  0x12   : > { %2214 = sst [smem:[#allocation57_spill]] %s1489_s24  ;;  %s654_s28 = sadd.s32 4294967294, %s1501_s27  }
  0x13   : > { %2215 = sst [smem:[#allocation58_spill]] %s1497_s26  ;;  %s30_s29 = sadd.s32 1, %s1497_s26 }
  0x14   : > { %s68_s30 = sadd.s32 1, %s1489_s24  ;;  %p31_p3 = scmp.ge.s32.totalorder %s30_s29, 2 }
  0x15   : > { %p78_p4 = scmp.ne.s32.totalorder %s1489_s24, %s1485_s23  ;;  %p79_p5 = scmp.eq.s32.totalorder %s653_s0, 1 }
  0x16   : > { %p84_p6 = scmp.ne.s32.totalorder %s1485_s23, %s1481_s22  ;;  %s2253_s29 = smov (%p31_p3, %s30_s29), 0 }
  0x17   : > { %2216 = sst [smem:[#allocation59_spill]] %s2253_s29  ;;  %p1586_p7 = por %p79_p5, %p78_p4 }
  0x18   : > { %p85_p8 = scmp.eq.s32.totalorder %s654_s28, 1  ;;  %s63_s5 = ssub.s32 %s1497_s26, %s2253_s29 }
  0x19   : > { %s2217_s4 = scalar_select %p1586_p7, 1, 0 }
  0x1a   : > { %p655_p9 = scmp.ge.s32.totalorder %s1501_s27, 1  ;;  %p66_p10 = scmp.eq.s32.totalorder %s63_s5, 0 }
  0x1b   : > { %p1593_p11 = por %p85_p8, %p84_p6  ;;  %p92_p12 = scmp.lt.s32.totalorder %s1501_s27, 3 }
  0x1c   : > { %s1599_s7 = scalar_select %p66_p10, %s1489_s24, %s68_s30  }
  0x1d   : > { %s2218_s6 = scalar_select %p1593_p11, 1, 0 }
  0x1e   : > { %2220 = sst [smem:[#allocation61_spill]] %s1599_s7  ;;  %p1601_p13 = pnand %p655_p9, %p92_p12 }
  0x1f   : > { %2219 = sst [smem:[#allocation60_spill]] %s2218_s6  ;;  %p1605_p0 = scmp.eq.s32.totalorder %s653_s0, 0 }
  0x20   : > { %s2221_s8 = scalar_select %p1601_p13, 1, 0 }
  0x21   : > { %s2222_s9 = scalar_select %p1605_p0, 1, 0 }
  0x22   : > { %p858_p1 = pneg %p1601_p13  ;;  %s1504_s10 = smov [#allocation6]  }
  0x23   : > { %s107_s11 = sshll.u32 %s1504_s10, 4  ;;  %s2224_s2 = sld [smem:[#allocation62_spill]]  ;;  %s108_s11 = int_to_ptr.vmem [resolvable:$true] %s107_s11 }
  0x24   : > { %p1613_p2 = pnand %p1605_p0, %p858_p1 }
  0x26   : > { %p941_p4 = pneg %p1613_p2 }
  0x29   : > { %s939_s15 = scalar_lea.hbm %s2224_s2, 128 }
  0x2a   : > { %p940_p3 = scmp.ne.s32.totalorder %s2224_s2, %s939_s15  ;;  %p946_p8 = scmp.lt.u32.totalorder %s939_s15, %s2224_s2 }
  0x2c   : > { %p942_p5 = pnand %p941_p4, %p940_p3 }
  0x2e   : > { %p943_p6 = pneg %p942_p5 }
  0x30   : > { %p948_p9 = pnand %p946_p8, %p943_p6 }
  0x32   : > { %951 = shalt.err (!%p948_p9)
}
  0x33   : > { %s952_s20 = scalar_lea.vmem %s108_s11, 128  ;;  %p960_p11 = scmp.lt.s32.totalorder %s108_s11, %s108_s11 }
  0x34   : > { %p953_p10 = scmp.ne.s32.totalorder %s108_s11, %s952_s20  ;;  %p961_p7 = scmp.lt.s32.totalorder %s952_s20, %s952_s20 }
  0x36   : > { %p955_p12 = pnand %p953_p10, %p941_p4  ;;  %p962_p0 = por %p961_p7, %p960_p11 }
  0x38   : > { %p956_p1 = pneg %p955_p12 }
  0x3a   : > { %p963_p13 = pnand %p962_p0, %p956_p1 }
  0x3c   : > { %966 = shalt.err (!%p963_p13)
}
  0x3d   : > { %861 = dma.hbm_to_vmem [thread:$0]  (!%p1613_p2), %s2224_s2, 128, %s108_s11, [#allocation7]  }
  0x3e   : > { %p2225_p3 = scmp.ne.s32.totalorder %s2221_s8, 0 }
  0x3f   : > { %p2226_p5 = scmp.ne.s32.totalorder (!%p2225_p3), %s2222_s9, 0 }
  0x40   : > { %120 = sbr.rel (%p2225_p3) target bundleno = 563 (0x233), region = 24 }
  0x47   : > { %1470 = dma.done.wait (%p2226_p5), [#allocation7], 128  }
  0x48   : > { %1472 = vsyncadd (%p2226_p5), [#allocation7], 4294967168  ;;  %s2205_s28 = sand.u32 1, %s1485_s23   ;;  %p868_p7 = scmp.eq.s32.totalorder %s1493_s25, 0 }
  0x49   : > { %s1642_s30 = sshll.u32 %s2205_s28, 3  ;;  %s152_s5 = sld [smem:[#allocation5]] }
  0x4a   : > { %s670_s10 = sld [smem:[#allocation5 + $0x1]]  ;;  %s1505_s11 = smov [#allocation2]  }
  0x4b   : > { %s166_s12 = sshll.u32 %s1505_s11, 4  ;;  %s1506_s8 = smov [#allocation2 + $0x1]   ;;  %s1645_s12 = int_to_ptr.vmem [resolvable:$true] %s166_s12 }
  0x4c   : > { %s186_s13 = sshll.u32 %s1506_s8, 4  ;;  %s1649_s9 = sld [smem:[#allocation5 + $0x2]]  ;;  %s1647_s13 = int_to_ptr.vmem [resolvable:$true] %s186_s13 }
  0x4d   : > { %s1651_s14 = sld [smem:[#allocation5 + $0x3]]  ;;  %s1665_s11 = scalar_lea.hbm %s2198_s1, 1024 }
  0x4f   : > { %p153_p11 = scmp.gt.s32.totalorder %s152_s5, 0  ;;  %p664_p13 = scmp.lt.s32.totalorder %s152_s5, 63 }
  0x50   : > { %p172_p0 = scmp.gt.s32.totalorder %s670_s10, 0  ;;  %p671_p2 = scmp.lt.s32.totalorder %s670_s10, 63 }
  0x51   : > { %s2255_s5 = smov (!%p153_p11, %s152_s5), 0 }
  0x52   : > { %s2257_s10 = smov (!%p172_p0, %s670_s10), 0  ;;  %s2259_s5 = smov (!%p664_p13, %s2255_s5), 63 }
  0x53   : > { %s2261_s10 = smov (!%p671_p2, %s2257_s10), 63  ;;  %s669_s15 = sshll.u32 %s2259_s5, 4 }
  0x54   : > { %s158_s18 = scalar_lea.hbm %s2198_s1, %s669_s15  ;;  %s676_s19 = sshll.u32 %s2261_s10, 4 }
  0x55   : > { %s967_s20 = scalar_lea.hbm %s158_s18, 16  ;;  %p972_p10 = scmp.lt.u32.totalorder %s158_s18, %s2198_s1 }
  0x56   : > { %p968_p6 = scmp.ne.s32.totalorder %s158_s18, %s967_s20  ;;  %p973_p12 = scmp.lt.u32.totalorder %s1665_s11, %s967_s20 }
  0x57   : > { %p975_p3 = scmp.lt.u32.totalorder %s967_s20, %s158_s18 }
  0x58   : > { %p969_p8 = pnand %p968_p6, %p868_p7  ;;  %p974_p1 = por %p973_p12, %p972_p10 }
  0x5a   : > { %p970_p9 = pneg %p969_p8  ;;  %p976_p5 = por %p975_p3, %p974_p1 }
  0x5c   : > { %p977_p11 = pnand %p976_p5, %p970_p9 }
  0x5e   : > { %980 = shalt.err (!%p977_p11)  }
  0x5f   : > { %s981_s5 = scalar_lea.vmem %s1645_s12, 16  ;;  %s1676_s10 = scalar_lea.vmem %s1645_s12, 256 }
  0x60   : > { %p982_p13 = scmp.ne.s32.totalorder %s1645_s12, %s981_s5  ;;  %p988_p6 = scmp.lt.s32.totalorder %s1645_s12, %s1645_s12 }
  0x61   : > { %p989_p8 = scmp.lt.s32.totalorder %s1676_s10, %s981_s5 }
  0x62   : > { %p983_p0 = pnand %p982_p13, %p868_p7 }
  0x63   : > { %p990_p10 = por %p989_p8, %p988_p6 }
  0x64   : > { %p984_p2 = pneg %p983_p0 }
  0x66   : > { %p991_p12 = pnand %p990_p10, %p984_p2 }
  0x68   : > { %994 = shalt.err (!%p991_p12)  }
  0x69   : > { %823 = dma.hbm_to_vmem [thread:$0]  (%p868_p7), %s158_s18, 16, %s1645_s12, [#allocation3] }
  0x6a   : > { %s177_s16 = scalar_lea.hbm %s2198_s1, %s676_s19 }
  0x6b   : > { %s995_s17 = scalar_lea.hbm %s177_s16, 16  ;;  %p1000_p11 = scmp.lt.u32.totalorder %s177_s16, %s2198_s1 }
  0x6c   : > { %p996_p1 = scmp.ne.s32.totalorder %s177_s16, %s995_s17  ;;  %p1001_p13 = scmp.lt.u32.totalorder %s1665_s11, %s995_s17 }
  0x6d   : > { %p1003_p2 = scmp.lt.u32.totalorder %s995_s17, %s177_s16 }
  0x6e   : > { %p997_p3 = pnand %p996_p1, %p868_p7  ;;  %p1002_p0 = por %p1001_p13, %p1000_p11 }
  0x70   : > { %p998_p5 = pneg %p997_p3  ;;  %p1004_p6 = por %p1003_p2, %p1002_p0 }
  0x72   : > { %p1005_p8 = pnand %p1004_p6, %p998_p5 }
  0x74   : > { %1008 = shalt.err (!%p1005_p8)  }
  0x75   : > { %s1009_s18 = scalar_lea.vmem %s1647_s13, 16  ;;  %p1016_p3 = scmp.lt.s32.totalorder %s1647_s13, %s1645_s12 }
  0x76   : > { %p1010_p10 = scmp.ne.s32.totalorder %s1647_s13, %s1009_s18  ;;  %p1017_p9 = scmp.lt.s32.totalorder %s1676_s10, %s1009_s18 }
  0x78   : > { %p1011_p12 = pnand %p1010_p10, %p868_p7  ;;  %p1018_p4 = por %p1017_p9, %p1016_p3 }
  0x7a   : > { %p1012_p1 = pneg %p1011_p12 }
  0x7c   : > { %p1019_p11 = pnand %p1018_p4, %p1012_p1 }
  0x7e   : > { %1022 = shalt.err (!%p1019_p11)  }
  0x7f   : > { %824 = dma.hbm_to_vmem [thread:$0]  (%p868_p7), %s177_s16, 16, %s1647_s13, [#allocation3] }
  0x80   : > { %p2227_p5 = scmp.gt.s32.totalorder %s1649_s9, 0  ;;  %s1507_s0 = smov [#allocation2 + $0x2]  }
  0x81   : > { %s206_s8 = sshll.u32 %s1507_s0, 4  ;;  %p2228_p0 = scmp.lt.s32.totalorder %s1649_s9, 63  ;;  %s207_s8 = int_to_ptr.vmem [resolvable:$true] %s206_s8 }
  0x82   : > { %s193_s19 = scalar_select %p2227_p5, %s1649_s9, 0 }
  0x83   : > { %s1508_s20 = smov [#allocation2 + $0x3]  }
  0x84   : > { %s2263_s19 = smov (!%p2228_p0, %s193_s19), 63  ;;  %s226_s21 = sshll.u32 %s1508_s20, 4  ;;  %s1729_s21 = int_to_ptr.vmem [resolvable:$true] %s226_s21 }
  0x85   : > { %s683_s5 = sshll.u32 %s2263_s19, 4 }
  0x86   : > { %s197_s17 = scalar_lea.hbm %s2198_s1, %s683_s5 }
  0x87   : > { %s1023_s18 = scalar_lea.hbm %s197_s17, 16  ;;  %p1028_p8 = scmp.lt.u32.totalorder %s197_s17, %s2198_s1 }
  0x88   : > { %p1024_p9 = scmp.ne.s32.totalorder %s197_s17, %s1023_s18  ;;  %p1029_p10 = scmp.lt.u32.totalorder %s1665_s11, %s1023_s18 }
  0x89   : > { %p1031_p1 = scmp.lt.u32.totalorder %s1023_s18, %s197_s17 }
  0x8a   : > { %p1025_p2 = pnand %p1024_p9, %p868_p7  ;;  %p1030_p12 = por %p1029_p10, %p1028_p8 }
  0x8c   : > { %p1026_p6 = pneg %p1025_p2  ;;  %p1032_p3 = por %p1031_p1, %p1030_p12 }
  0x8e   : > { %p1033_p11 = pnand %p1032_p3, %p1026_p6 }
  0x90   : > { %1036 = shalt.err (!%p1033_p11)  }
  0x91   : > { %s1037_s9 = scalar_lea.vmem %s207_s8, 16  ;;  %p1044_p9 = scmp.lt.s32.totalorder %s207_s8, %s1645_s12 }
  0x92   : > { %p1038_p5 = scmp.ne.s32.totalorder %s207_s8, %s1037_s9  ;;  %p1045_p2 = scmp.lt.s32.totalorder %s1676_s10, %s1037_s9 }
  0x94   : > { %p1039_p0 = pnand %p1038_p5, %p868_p7  ;;  %p1046_p13 = por %p1045_p2, %p1044_p9 }
  0x96   : > { %p1040_p4 = pneg %p1039_p0 }
  0x98   : > { %p1047_p8 = pnand %p1046_p13, %p1040_p4 }
  0x9a   : > { %1050 = shalt.err (!%p1047_p8)  }
  0x9b   : > { %825 = dma.hbm_to_vmem [thread:$0]  (%p868_p7), %s197_s17, 16, %s207_s8, [#allocation3] }
  0x9c   : > { %p2229_p6 = scmp.gt.s32.totalorder %s1651_s14, 0  ;;  %s1731_s0 = sld [smem:[#allocation5 + $0x4]] }
  0x9d   : > { %p2230_p10 = scmp.lt.s32.totalorder %s1651_s14, 63  ;;  %s1735_s5 = sld [smem:[#allocation5 + $0x5]] }
  0x9e   : > { %s213_s19 = scalar_select %p2229_p6, %s1651_s14, 0 }
  0x9f   : > { %s1509_s15 = smov [#allocation2 + $0x4]  }
  0xa0   : > { %s2265_s19 = smov (!%p2230_p10, %s213_s19), 63  ;;  %s246_s20 = sshll.u32 %s1509_s15, 4  ;;  %s1740_s20 = int_to_ptr.vmem [resolvable:$true] %s246_s20 }
  0xa1   : > { %s690_s28 = sshll.u32 %s2265_s19, 4 }
  0xa2   : > { %s217_s16 = scalar_lea.hbm %s2198_s1, %s690_s28 }
  0xa3   : > { %s1051_s8 = scalar_lea.hbm %s217_s16, 16  ;;  %p1056_p1 = scmp.lt.u32.totalorder %s217_s16, %s2198_s1 }
  0xa4   : > { %p1052_p13 = scmp.ne.s32.totalorder %s217_s16, %s1051_s8  ;;  %p1057_p3 = scmp.lt.u32.totalorder %s1665_s11, %s1051_s8 }
  0xa5   : > { %p1059_p5 = scmp.lt.u32.totalorder %s1051_s8, %s217_s16 }
  0xa6   : > { %p1053_p4 = pnand %p1052_p13, %p868_p7  ;;  %p1058_p11 = por %p1057_p3, %p1056_p1 }
  0xa8   : > { %p1054_p12 = pneg %p1053_p4  ;;  %p1060_p0 = por %p1059_p5, %p1058_p11 }
  0xaa   : > { %p1061_p9 = pnand %p1060_p0, %p1054_p12 }
  0xac   : > { %1064 = shalt.err (!%p1061_p9)  }
  0xad   : > { %s1065_s14 = scalar_lea.vmem %s1729_s21, 16  ;;  %p1072_p10 = scmp.lt.s32.totalorder %s1729_s21, %s1645_s12 }
  0xae   : > { %p1066_p2 = scmp.ne.s32.totalorder %s1729_s21, %s1065_s14  ;;  %p1073_p13 = scmp.lt.s32.totalorder %s1676_s10, %s1065_s14 }
  0xb0   : > { %p1067_p8 = pnand %p1066_p2, %p868_p7  ;;  %p1074_p4 = por %p1073_p13, %p1072_p10 }
  0xb2   : > { %p1068_p6 = pneg %p1067_p8 }
  0xb4   : > { %p1075_p1 = pnand %p1074_p4, %p1068_p6 }
  0xb6   : > { %1078 = shalt.err (!%p1075_p1)  }
  0xb7   : > { %826 = dma.hbm_to_vmem [thread:$0]  (%p868_p7), %s217_s16, 16, %s1729_s21, [#allocation3] }
  0xb8   : > { %p232_p12 = scmp.gt.s32.totalorder %s1731_s0, 0  ;;  %p692_p3 = scmp.lt.s32.totalorder %s1731_s0, 63 }
  0xb9   : > { %s1760_s19 = sld [smem:[#allocation5 + $0x6]]  ;;  %p252_p11 = scmp.gt.s32.totalorder %s1735_s5, 0 }
  0xba   : > { %s2267_s0 = smov (!%p232_p12, %s1731_s0), 0  ;;  %s1510_s18 = smov [#allocation2 + $0x5]  }
  0xbb   : > { %s2269_s0 = smov (!%p692_p3, %s2267_s0), 63  ;;  %s266_s13 = sshll.u32 %s1510_s18, 4  ;;  %s1769_s13 = int_to_ptr.vmem [resolvable:$true] %s266_s13 }
  0xbc   : > { %s253_s28 = scalar_select %p252_p11, %s1735_s5, 0 }
  0xbd   : > { %s697_s15 = sshll.u32 %s2269_s0, 4 }
  0xbe   : > { %s237_s9 = scalar_lea.hbm %s2198_s1, %s697_s15 }
  0xbf   : > { %s1079_s21 = scalar_lea.hbm %s237_s9, 16  ;;  %p1084_p8 = scmp.lt.u32.totalorder %s237_s9, %s2198_s1 }
  0xc0   : > { %p1080_p0 = scmp.ne.s32.totalorder %s237_s9, %s1079_s21  ;;  %p1085_p6 = scmp.lt.u32.totalorder %s1665_s11, %s1079_s21 }
  0xc1   : > { %p1087_p13 = scmp.lt.u32.totalorder %s1079_s21, %s237_s9 }
  0xc2   : > { %p1081_p9 = pnand %p1080_p0, %p868_p7  ;;  %p1086_p10 = por %p1085_p6, %p1084_p8 }
  0xc4   : > { %p1082_p2 = pneg %p1081_p9  ;;  %p1088_p4 = por %p1087_p13, %p1086_p10 }
  0xc6   : > { %p1089_p1 = pnand %p1088_p4, %p1082_p2 }
  0xc8   : > { %1092 = shalt.err (!%p1089_p1)  }
  0xc9   : > { %s1093_s0 = scalar_lea.vmem %s1740_s20, 16  ;;  %p1100_p0 = scmp.lt.s32.totalorder %s1740_s20, %s1645_s12 }
  0xca   : > { %p1094_p12 = scmp.ne.s32.totalorder %s1740_s20, %s1093_s0  ;;  %p1101_p9 = scmp.lt.s32.totalorder %s1676_s10, %s1093_s0 }
  0xcc   : > { %p1095_p3 = pnand %p1094_p12, %p868_p7  ;;  %p1102_p5 = por %p1101_p9, %p1100_p0 }
  0xce   : > { %p1096_p11 = pneg %p1095_p3 }
  0xd0   : > { %p1103_p6 = pnand %p1102_p5, %p1096_p11 }
  0xd2   : > { %1106 = shalt.err (!%p1103_p6)  }
  0xd3   : > { %827 = dma.hbm_to_vmem [thread:$0]  (%p868_p7), %s237_s9, 16, %s1740_s20, [#allocation3] }
  0xd4   : > { %p2231_p2 = scmp.lt.s32.totalorder %s1735_s5, 63  ;;  %s1511_s21 = smov [#allocation2 + $0x6]  }
  0xd5   : > { %s286_s16 = sshll.u32 %s1511_s21, 4  ;;  %s1813_s16 = int_to_ptr.vmem [resolvable:$true] %s286_s16 }
  0xd6   : > { %s2271_s28 = smov (!%p2231_p2, %s253_s28), 63 }
  0xd7   : > { %s704_s15 = sshll.u32 %s2271_s28, 4 }
  0xd8   : > { %s257_s17 = scalar_lea.hbm %s2198_s1, %s704_s15 }
  0xd9   : > { %s1107_s14 = scalar_lea.hbm %s257_s17, 16  ;;  %p1112_p1 = scmp.lt.u32.totalorder %s257_s17, %s2198_s1 }
  0xda   : > { %p1108_p5 = scmp.ne.s32.totalorder %s257_s17, %s1107_s14  ;;  %p1113_p12 = scmp.lt.u32.totalorder %s1665_s11, %s1107_s14 }
  0xdb   : > { %p1115_p11 = scmp.lt.u32.totalorder %s1107_s14, %s257_s17 }
  0xdc   : > { %p1109_p13 = pnand %p1108_p5, %p868_p7  ;;  %p1114_p3 = por %p1113_p12, %p1112_p1 }
  0xde   : > { %p1110_p4 = pneg %p1109_p13  ;;  %p1116_p0 = por %p1115_p11, %p1114_p3 }
  0xe0   : > { %p1117_p9 = pnand %p1116_p0, %p1110_p4 }
  0xe2   : > { %1120 = shalt.err (!%p1117_p9)  }
  0xe3   : > { %s1121_s5 = scalar_lea.vmem %s1769_s13, 16  ;;  %p1128_p13 = scmp.lt.s32.totalorder %s1769_s13, %s1645_s12 }
  0xe4   : > { %p1122_p6 = scmp.ne.s32.totalorder %s1769_s13, %s1121_s5  ;;  %p1129_p10 = scmp.lt.s32.totalorder %s1676_s10, %s1121_s5 }
  0xe6   : > { %p1123_p2 = pnand %p1122_p6, %p868_p7  ;;  %p1130_p8 = por %p1129_p10, %p1128_p13 }
  0xe8   : > { %p1124_p5 = pneg %p1123_p2 }
  0xea   : > { %p1131_p1 = pnand %p1130_p8, %p1124_p5 }
  0xec   : > { %1134 = shalt.err (!%p1131_p1)  }
  0xed   : > { %828 = dma.hbm_to_vmem [thread:$0]  (%p868_p7), %s257_s17, 16, %s1769_s13, [#allocation3] }
  0xee   : > { %p2232_p4 = scmp.gt.s32.totalorder %s1760_s19, 0  ;;  %s1815_s20 = sld [smem:[#allocation5 + $0x7]] }
  0xef   : > { %p2233_p12 = scmp.lt.s32.totalorder %s1760_s19, 63  ;;  %s1512_s9 = smov [#allocation2 + $0x7]  }
  0xf0   : > { %s273_s2 = scalar_select %p2232_p4, %s1760_s19, 0 }
  0xf1   : > { %s306_s15 = sshll.u32 %s1512_s9, 4  ;;  %s1823_s15 = int_to_ptr.vmem [resolvable:$true] %s306_s15 }
  0xf2   : > { %s2273_s2 = smov (!%p2233_p12, %s273_s2), 63 }
  0xf3   : > { %s711_s28 = sshll.u32 %s2273_s2, 4 }
  0xf4   : > { %s277_s21 = scalar_lea.hbm %s2198_s1, %s711_s28 }
  0xf5   : > { %s1135_s13 = scalar_lea.hbm %s277_s21, 16  ;;  %p1140_p0 = scmp.lt.u32.totalorder %s277_s21, %s2198_s1 }
  0xf6   : > { %p1136_p10 = scmp.ne.s32.totalorder %s277_s21, %s1135_s13  ;;  %p1141_p9 = scmp.lt.u32.totalorder %s1665_s11, %s1135_s13 }
  0xf7   : > { %p1143_p2 = scmp.lt.u32.totalorder %s1135_s13, %s277_s21 }
  0xf8   : > { %p1137_p3 = pnand %p1136_p10, %p868_p7  ;;  %p1142_p6 = por %p1141_p9, %p1140_p0 }
  0xfa   : > { %p1138_p11 = pneg %p1137_p3  ;;  %p1144_p5 = por %p1143_p2, %p1142_p6 }
  0xfc   : > { %p1145_p13 = pnand %p1144_p5, %p1138_p11 }
  0xfe   : > { %1148 = shalt.err (!%p1145_p13)  }
  0xff   : > { %s1149_s19 = scalar_lea.vmem %s1813_s16, 16  ;;  %p1156_p10 = scmp.lt.s32.totalorder %s1813_s16, %s1645_s12 }
 0x100   : > { %p1150_p1 = scmp.ne.s32.totalorder %s1813_s16, %s1149_s19  ;;  %p1157_p3 = scmp.lt.s32.totalorder %s1676_s10, %s1149_s19 }
 0x102   : > { %p1151_p4 = pnand %p1150_p1, %p868_p7  ;;  %p1158_p8 = por %p1157_p3, %p1156_p10 }
 0x104   : > { %p1152_p12 = pneg %p1151_p4 }
 0x106   : > { %p1159_p0 = pnand %p1158_p8, %p1152_p12 }
 0x108   : > { %1162 = shalt.err (!%p1159_p0)  }
 0x109   : > { %829 = dma.hbm_to_vmem [thread:$0]  (%p868_p7), %s277_s21, 16, %s1813_s16, [#allocation3] }
 0x10a   : > { %p292_p11 = scmp.gt.s32.totalorder %s1815_s20, 0  ;;  %p713_p9 = scmp.lt.s32.totalorder %s1815_s20, 63 }
 0x10b   : > { %s136_s0 = ssub.s32 0, %s1493_s25  ;;  %s310_s5 = sadd.s32 1, %s1493_s25 }
 0x10c   : > { %s2275_s20 = smov (!%p292_p11, %s1815_s20), 0  ;;  %s1847_s2 = smin.u32 %s1493_s25, %s136_s0 }
 0x10d   : > { %s2277_s20 = smov (!%p713_p9, %s2275_s20), 63  ;;  %s138_s28 = sand.u32 1, %s1847_s2  }
 0x10e   : > { %p1850_p8 = scmp.lt.s32.totalorder %s310_s5, 2  ;;  %s718_s18 = sshll.u32 %s2277_s20, 4 }
 0x10f   : > { %s139_s8 = ssub.s32 0, %s138_s28  ;;  %s297_s21 = scalar_lea.hbm %s2198_s1, %s718_s18 }
 0x110   : > { %s2234_s9 = scalar_select %p1850_p8, 1, 0 }
 0x111   : > { %s800_s17 = sshll.u32 %s1493_s25, 3  ;;  %s1163_s14 = scalar_lea.hbm %s297_s21, 16 }
 0x112   : > { %p1164_p6 = scmp.ne.s32.totalorder %s297_s21, %s1163_s14  ;;  %p1168_p13 = scmp.lt.u32.totalorder %s297_s21, %s2198_s1 }
 0x113   : > { %p1169_p1 = scmp.lt.u32.totalorder %s1665_s11, %s1163_s14  ;;  %p1171_p12 = scmp.lt.u32.totalorder %s1163_s14, %s297_s21 }
 0x114   : > { %p1165_p2 = pnand %p1164_p6, %p868_p7 }
 0x115   : > { %p1170_p4 = por %p1169_p1, %p1168_p13 }
 0x116   : > { %p1166_p5 = pneg %p1165_p2 }
 0x117   : > { %p1172_p10 = por %p1171_p12, %p1170_p4 }
 0x119   : > { %p1173_p3 = pnand %p1172_p10, %p1166_p5 }
 0x11b   : > { %1176 = shalt.err (!%p1173_p3)  }
 0x11c   : > { %s1177_s20 = scalar_lea.vmem %s1823_s15, 16  ;;  %p1184_p6 = scmp.lt.s32.totalorder %s1823_s15, %s1645_s12 }
 0x11d   : > { %p1178_p0 = scmp.ne.s32.totalorder %s1823_s15, %s1177_s20  ;;  %p1185_p2 = scmp.lt.s32.totalorder %s1676_s10, %s1177_s20 }
 0x11f   : > { %p1179_p11 = pnand %p1178_p0, %p868_p7  ;;  %p1186_p8 = por %p1185_p2, %p1184_p6 }
 0x121   : > { %p1180_p9 = pneg %p1179_p11 }
 0x123   : > { %p1187_p1 = pnand %p1186_p8, %p1180_p9 }
 0x125   : > { %1190 = shalt.err (!%p1187_p1)  }
 0x126   : > { %830 = dma.hbm_to_vmem [thread:$0]  (%p868_p7), %s297_s21, 16, %s1823_s15, [#allocation3] }
 0x127   : > { %p2235_p5 = scmp.lt.s32.totalorder %s1493_s25, 0  ;;  %s1876_s5 = sadd.s32 8, %s800_s17 }
 0x128   : > { %p2236_p4 = scmp.ne.s32.totalorder %s2234_s9, 0  ;;  %s339_s19 = sadd.s32 1, %s1876_s5 }
 0x129   : > { %s2279_s8 = smov (!%p2235_p5, %s139_s8), %s138_s28 }
 0x12a   : > { %p662_p13 = scmp.lt.s32.totalorder %s2279_s8, 0  ;;  %s145_s2 = sadd.s32 2, %s2279_s8 }
 0x12b   : > { %s832_s18 = scalar_select %p2236_p4, [#allocation5], [#allocation44] }
 0x12c   : > { %s2281_s2 = smov (!%p662_p13, %s145_s2), %s2279_s8  ;;  %s2283_s19 = smov (!%p2236_p4, %s339_s19), 0 }
 0x12d   : > { %s833_s13 = scalar_select %p2236_p4, %s1876_s5, 0 }
 0x12e   : > { %s317_s16 = ssub.s32 1, %s2281_s2 }
 0x12f   : > { %s318_s21 = sld [smem:[%s832_s18 + %s833_s13]]  ;;  %s727_s14 = sshll.u32 %s317_s16, 3 }
 0x130   : > { %s1887_s28 = scalar_lea.vmem [#allocation2], %s727_s14  ;;  %s360_s14 = sadd.s32 2, %s1876_s5 }
 0x131   : > { %s335_s17 = sshll.u32 %s1887_s28, 4  ;;  %s578_s0 = scalar_lea.vmem %s1887_s28, 1 [#allocation2]  ;;  %s336_s17 = int_to_ptr.vmem [resolvable:$true] %s335_s17 }
 0x132   : > { %s835_s8 = scalar_select %p2236_p4, [#allocation5], [#allocation45] }
 0x133   : > { %s356_s18 = sshll.u32 %s578_s0, 4  ;;  %s583_s7 = scalar_lea.vmem %s1887_s28, 2 [#allocation2]  ;;  %s1898_s18 = int_to_ptr.vmem [resolvable:$true] %s356_s18 }
 0x134   : > { %s1896_s20 = sld [smem:[%s835_s8 + %s2283_s19]]  ;;  %s1905_s24 = scalar_lea.sflag [#allocation3], %s317_s16 }
 0x135   : > { %p319_p7 = scmp.gt.s32.totalorder %s318_s21, 0  ;;  %p721_p8 = scmp.lt.s32.totalorder %s318_s21, 63 }
 0x137   : > { %s2285_s21 = smov (!%p319_p7, %s318_s21), 0 }
 0x138   : > { %s2287_s21 = smov (!%p721_p8, %s2285_s21), 63 }
 0x139   : > { %s726_s13 = sshll.u32 %s2287_s21, 4 }
 0x13a   : > { %s324_s26 = scalar_lea.hbm %s2198_s1, %s726_s13 }
 0x13b   : > { %s1191_s6 = scalar_lea.hbm %s324_s26, 16  ;;  %p1196_p0 = scmp.lt.u32.totalorder %s324_s26, %s2198_s1 }
 0x13c   : > { %p1192_p12 = scmp.ne.s32.totalorder %s324_s26, %s1191_s6  ;;  %p1197_p11 = scmp.lt.u32.totalorder %s1665_s11, %s1191_s6 }
 0x13d   : > { %p1199_p6 = scmp.lt.u32.totalorder %s1191_s6, %s324_s26 }
 0x13e   : > { %p1193_p10 = pnand %p1192_p12, %p2236_p4  ;;  %p1198_p9 = por %p1197_p11, %p1196_p0 }
 0x140   : > { %p1194_p3 = pneg %p1193_p10  ;;  %p1200_p2 = por %p1199_p6, %p1198_p9 }
 0x142   : > { %p1201_p1 = pnand %p1200_p2, %p1194_p3 }
 0x144   : > { %1204 = shalt.err (!%p1201_p1)  }
 0x145   : > { %s1205_s29 = scalar_lea.vmem %s336_s17, 16  ;;  %p1212_p8 = scmp.lt.s32.totalorder %s336_s17, %s1645_s12 }
 0x146   : > { %p1206_p5 = scmp.ne.s32.totalorder %s336_s17, %s1205_s29  ;;  %p1213_p12 = scmp.lt.s32.totalorder %s1676_s10, %s1205_s29 }
 0x148   : > { %p1207_p13 = pnand %p1206_p5, %p2236_p4  ;;  %p1214_p10 = por %p1213_p12, %p1212_p8 }
 0x14a   : > { %p1208_p7 = pneg %p1207_p13 }
 0x14c   : > { %p1215_p0 = pnand %p1214_p10, %p1208_p7 }
 0x14e   : > { %1218 = shalt.err (!%p1215_p0)  }
 0x14f   : > { %834 = dma.hbm_to_vmem [thread:$0]  (%p2236_p4), %s324_s26, 16, %s336_s17, %s1905_s24 }
 0x150   : > { %p341_p3 = scmp.gt.s32.totalorder %s1896_s20, 0  ;;  %p728_p11 = scmp.lt.s32.totalorder %s1896_s20, 63 }
 0x151   : > { %s838_s6 = scalar_select %p2236_p4, [#allocation5], [#allocation46] }
 0x152   : > { %s2289_s20 = smov (!%p341_p3, %s1896_s20), 0  ;;  %s2291_s14 = smov (!%p2236_p4, %s360_s14), 0 }
 0x153   : > { %s2293_s20 = smov (!%p728_p11, %s2289_s20), 63  ;;  %s1927_s16 = sld [smem:[%s838_s6 + %s2291_s14]] }
 0x154   : > { %s1931_s15 = sshll.u32 %s583_s7, 4  ;;  %s733_s21 = sshll.u32 %s2293_s20, 4  ;;  %s1965_s15 = int_to_ptr.vmem [resolvable:$true] %s1931_s15 }
 0x155   : > { %s381_s8 = sadd.s32 3, %s1876_s5  ;;  %s346_s26 = scalar_lea.hbm %s2198_s1, %s733_s21 }
 0x156   : > { %s588_s17 = scalar_lea.vmem %s1887_s28, 3 [#allocation2]  ;;  %s1219_s0 = scalar_lea.hbm %s346_s26, 16 }
 0x157   : > { %p1220_p9 = scmp.ne.s32.totalorder %s346_s26, %s1219_s0  ;;  %p1224_p1 = scmp.lt.u32.totalorder %s346_s26, %s2198_s1 }
 0x158   : > { %p1225_p5 = scmp.lt.u32.totalorder %s1665_s11, %s1219_s0  ;;  %p1227_p7 = scmp.lt.u32.totalorder %s1219_s0, %s346_s26 }
 0x159   : > { %p1221_p6 = pnand %p1220_p9, %p2236_p4 }
 0x15a   : > { %p1226_p13 = por %p1225_p5, %p1224_p1 }
 0x15b   : > { %p1222_p2 = pneg %p1221_p6 }
 0x15c   : > { %p1228_p8 = por %p1227_p7, %p1226_p13 }
 0x15e   : > { %p1229_p12 = pnand %p1228_p8, %p1222_p2 }
 0x160   : > { %1232 = shalt.err (!%p1229_p12)  }
 0x161   : > { %s1233_s7 = scalar_lea.vmem %s1898_s18, 16  ;;  %p1240_p11 = scmp.lt.s32.totalorder %s1898_s18, %s1645_s12 }
 0x162   : > { %p1234_p10 = scmp.ne.s32.totalorder %s1898_s18, %s1233_s7  ;;  %p1241_p9 = scmp.lt.s32.totalorder %s1676_s10, %s1233_s7 }
 0x164   : > { %p1235_p0 = pnand %p1234_p10, %p2236_p4  ;;  %p1242_p6 = por %p1241_p9, %p1240_p11 }
 0x166   : > { %p1236_p3 = pneg %p1235_p0 }
 0x168   : > { %p1243_p1 = pnand %p1242_p6, %p1236_p3 }
 0x16a   : > { %1246 = shalt.err (!%p1243_p1)  }
 0x16b   : > { %837 = dma.hbm_to_vmem [thread:$0]  (%p2236_p4), %s346_s26, 16, %s1898_s18, %s1905_s24 }
 0x16c   : > { %s841_s22 = scalar_select %p2236_p4, [#allocation5], [#allocation47] }
 0x16d   : > { %s2295_s8 = smov (!%p2236_p4, %s381_s8), 0  ;;  %p362_p2 = scmp.gt.s32.totalorder %s1927_s16, 0 }
 0x16e   : > { %p735_p5 = scmp.lt.s32.totalorder %s1927_s16, 63  ;;  %s1961_s20 = sld [smem:[%s841_s22 + %s2295_s8]] }
 0x16f   : > { %s2297_s16 = smov (!%p362_p2, %s1927_s16), 0  ;;  %s1967_s14 = sshll.u32 %s588_s17, 4  ;;  %s399_s14 = int_to_ptr.vmem [resolvable:$true] %s1967_s14 }
 0x170   : > { %s2299_s16 = smov (!%p735_p5, %s2297_s16), 63  ;;  %s402_s21 = sadd.s32 4, %s1876_s5 }
 0x171   : > { %s844_s6 = scalar_select %p2236_p4, [#allocation5], [#allocation48] }
 0x172   : > { %s740_s18 = sshll.u32 %s2299_s16, 4 }
 0x173   : > { %s367_s26 = scalar_lea.hbm %s2198_s1, %s740_s18 }
 0x174   : > { %s1247_s0 = scalar_lea.hbm %s367_s26, 16  ;;  %p1252_p10 = scmp.lt.u32.totalorder %s367_s26, %s2198_s1 }
 0x175   : > { %p1248_p7 = scmp.ne.s32.totalorder %s367_s26, %s1247_s0  ;;  %p1253_p0 = scmp.lt.u32.totalorder %s1665_s11, %s1247_s0 }
 0x176   : > { %p1255_p11 = scmp.lt.u32.totalorder %s1247_s0, %s367_s26 }
 0x177   : > { %p1249_p8 = pnand %p1248_p7, %p2236_p4  ;;  %p1254_p3 = por %p1253_p0, %p1252_p10 }
 0x179   : > { %p1250_p12 = pneg %p1249_p8  ;;  %p1256_p9 = por %p1255_p11, %p1254_p3 }
 0x17b   : > { %p1257_p6 = pnand %p1256_p9, %p1250_p12 }
 0x17d   : > { %1260 = shalt.err (!%p1257_p6)  }
 0x17e   : > { %s1261_s16 = scalar_lea.vmem %s1965_s15, 16  ;;  %p1268_p7 = scmp.lt.s32.totalorder %s1965_s15, %s1645_s12 }
 0x17f   : > { %p1262_p1 = scmp.ne.s32.totalorder %s1965_s15, %s1261_s16  ;;  %p1269_p8 = scmp.lt.s32.totalorder %s1676_s10, %s1261_s16 }
 0x181   : > { %p1263_p2 = pnand %p1262_p1, %p2236_p4  ;;  %p1270_p13 = por %p1269_p8, %p1268_p7 }
 0x183   : > { %p1264_p5 = pneg %p1263_p2 }
 0x185   : > { %p1271_p0 = pnand %p1270_p13, %p1264_p5 }
 0x187   : > { %1274 = shalt.err (!%p1271_p0)  }
 0x188   : > { %840 = dma.hbm_to_vmem [thread:$0]  (%p2236_p4), %s367_s26, 16, %s1965_s15, %s1905_s24 }
 0x189   : > { %p2237_p12 = scmp.gt.s32.totalorder %s1961_s20, 0  ;;  %p742_p10 = scmp.lt.s32.totalorder %s1961_s20, 63 }
 0x18a   : > { %s593_s7 = scalar_lea.vmem %s1887_s28, 4 [#allocation2]  ;;  %s2301_s21 = smov (!%p2236_p4, %s402_s21), 0 }
 0x18b   : > { %s384_s17 = scalar_select %p2237_p12, %s1961_s20, 0 }
 0x18c   : > { %s2004_s22 = sld [smem:[%s844_s6 + %s2301_s21]]  ;;  %s2006_s13 = sshll.u32 %s593_s7, 4  ;;  %s2035_s13 = int_to_ptr.vmem [resolvable:$true] %s2006_s13 }
 0x18d   : > { %s2303_s17 = smov (!%p742_p10, %s384_s17), 63  ;;  %s423_s26 = sadd.s32 5, %s1876_s5 }
 0x18e   : > { %s747_s18 = sshll.u32 %s2303_s17, 4 }
 0x18f   : > { %s388_s15 = scalar_lea.hbm %s2198_s1, %s747_s18 }
 0x190   : > { %s1275_s8 = scalar_lea.hbm %s388_s15, 16  ;;  %p1280_p9 = scmp.lt.u32.totalorder %s388_s15, %s2198_s1 }
 0x191   : > { %p1276_p13 = scmp.ne.s32.totalorder %s388_s15, %s1275_s8  ;;  %p1281_p6 = scmp.lt.u32.totalorder %s1665_s11, %s1275_s8 }
 0x192   : > { %p1283_p2 = scmp.lt.u32.totalorder %s1275_s8, %s388_s15 }
 0x193   : > { %p1277_p3 = pnand %p1276_p13, %p2236_p4  ;;  %p1282_p1 = por %p1281_p6, %p1280_p9 }
 0x195   : > { %p1278_p11 = pneg %p1277_p3  ;;  %p1284_p5 = por %p1283_p2, %p1282_p1 }
 0x197   : > { %p1285_p7 = pnand %p1284_p5, %p1278_p11 }
 0x199   : > { %1288 = shalt.err (!%p1285_p7)  }
 0x19a   : > { %s1289_s6 = scalar_lea.vmem %s399_s14, 16  ;;  %p1296_p10 = scmp.lt.s32.totalorder %s399_s14, %s1645_s12 }
 0x19b   : > { %p1290_p8 = scmp.ne.s32.totalorder %s399_s14, %s1289_s6  ;;  %p1297_p13 = scmp.lt.s32.totalorder %s1676_s10, %s1289_s6 }
 0x19d   : > { %p1291_p0 = pnand %p1290_p8, %p2236_p4  ;;  %p1298_p3 = por %p1297_p13, %p1296_p10 }
 0x19f   : > { %p1292_p12 = pneg %p1291_p0 }
 0x1a1   : > { %p1299_p6 = pnand %p1298_p3, %p1292_p12 }
 0x1a3   : > { %1302 = shalt.err (!%p1299_p6)  }
 0x1a4   : > { %843 = dma.hbm_to_vmem [thread:$0]  (%p2236_p4), %s388_s15, 16, %s399_s14, %s1905_s24 }
 0x1a5   : > { %s847_s21 = scalar_select %p2236_p4, [#allocation5], [#allocation49] }
 0x1a6   : > { %s2305_s26 = smov (!%p2236_p4, %s423_s26), 0  ;;  %p404_p11 = scmp.gt.s32.totalorder %s2004_s22, 0 }
 0x1a7   : > { %p749_p9 = scmp.lt.s32.totalorder %s2004_s22, 63  ;;  %s2031_s16 = sld [smem:[%s847_s21 + %s2305_s26]] }
 0x1a8   : > { %s2307_s22 = smov (!%p404_p11, %s2004_s22), 0  ;;  %s598_s17 = scalar_lea.vmem %s1887_s28, 5 [#allocation2] }
 0x1a9   : > { %s2309_s22 = smov (!%p749_p9, %s2307_s22), 63  ;;  %s444_s14 = sadd.s32 6, %s1876_s5 }
 0x1aa   : > { %s850_s7 = scalar_select %p2236_p4, [#allocation5], [#allocation50] }
 0x1ab   : > { %s754_s18 = sshll.u32 %s2309_s22, 4 }
 0x1ac   : > { %s409_s15 = scalar_lea.hbm %s2198_s1, %s754_s18 }
 0x1ad   : > { %s1303_s8 = scalar_lea.hbm %s409_s15, 16  ;;  %p1308_p8 = scmp.lt.u32.totalorder %s409_s15, %s2198_s1 }
 0x1ae   : > { %p1304_p2 = scmp.ne.s32.totalorder %s409_s15, %s1303_s8  ;;  %p1309_p0 = scmp.lt.u32.totalorder %s1665_s11, %s1303_s8 }
 0x1af   : > { %p1311_p10 = scmp.lt.u32.totalorder %s1303_s8, %s409_s15 }
 0x1b0   : > { %p1305_p5 = pnand %p1304_p2, %p2236_p4  ;;  %p1310_p12 = por %p1309_p0, %p1308_p8 }
 0x1b2   : > { %p1306_p7 = pneg %p1305_p5  ;;  %p1312_p13 = por %p1311_p10, %p1310_p12 }
 0x1b4   : > { %p1313_p3 = pnand %p1312_p13, %p1306_p7 }
 0x1b6   : > { %1316 = shalt.err (!%p1313_p3)  }
 0x1b7   : > { %s1317_s22 = scalar_lea.vmem %s2035_s13, 16  ;;  %p1324_p2 = scmp.lt.s32.totalorder %s2035_s13, %s1645_s12 }
 0x1b8   : > { %p1318_p6 = scmp.ne.s32.totalorder %s2035_s13, %s1317_s22  ;;  %p1325_p5 = scmp.lt.s32.totalorder %s1676_s10, %s1317_s22 }
 0x1ba   : > { %p1319_p11 = pnand %p1318_p6, %p2236_p4  ;;  %p1326_p1 = por %p1325_p5, %p1324_p2 }
 0x1bc   : > { %p1320_p9 = pneg %p1319_p11 }
 0x1be   : > { %p1327_p0 = pnand %p1326_p1, %p1320_p9 }
 0x1c0   : > { %1330 = shalt.err (!%p1327_p0)  }
 0x1c1   : > { %846 = dma.hbm_to_vmem [thread:$0]  (%p2236_p4), %s409_s15, 16, %s2035_s13, %s1905_s24 }
 0x1c2   : > { %p2238_p7 = scmp.gt.s32.totalorder %s2031_s16, 0  ;;  %p756_p8 = scmp.lt.s32.totalorder %s2031_s16, 63 }
 0x1c3   : > { %s440_s6 = sshll.u32 %s598_s17, 4  ;;  %s2311_s14 = smov (!%p2236_p4, %s444_s14), 0  ;;  %s441_s6 = int_to_ptr.vmem [resolvable:$true] %s440_s6 }
 0x1c4   : > { %s426_s29 = scalar_select %p2238_p7, %s2031_s16, 0 }
 0x1c5   : > { %s2073_s21 = sld [smem:[%s850_s7 + %s2311_s14]]  ;;  %s603_s19 = scalar_lea.vmem %s1887_s28, 6 [#allocation2] }
 0x1c6   : > { %s2313_s29 = smov (!%p756_p8, %s426_s29), 63  ;;  %s465_s15 = sadd.s32 7, %s1876_s5 }
 0x1c7   : > { %s761_s18 = sshll.u32 %s2313_s29, 4 }
 0x1c8   : > { %s430_s13 = scalar_lea.hbm %s2198_s1, %s761_s18 }
 0x1c9   : > { %s1331_s26 = scalar_lea.hbm %s430_s13, 16  ;;  %p1336_p13 = scmp.lt.u32.totalorder %s430_s13, %s2198_s1 }
 0x1ca   : > { %p1332_p1 = scmp.ne.s32.totalorder %s430_s13, %s1331_s26  ;;  %p1337_p3 = scmp.lt.u32.totalorder %s1665_s11, %s1331_s26 }
 0x1cb   : > { %p1339_p11 = scmp.lt.u32.totalorder %s1331_s26, %s430_s13 }
 0x1cc   : > { %p1333_p12 = pnand %p1332_p1, %p2236_p4  ;;  %p1338_p6 = por %p1337_p3, %p1336_p13 }
 0x1ce   : > { %p1334_p10 = pneg %p1333_p12  ;;  %p1340_p9 = por %p1339_p11, %p1338_p6 }
 0x1d0   : > { %p1341_p2 = pnand %p1340_p9, %p1334_p10 }
 0x1d2   : > { %1344 = shalt.err (!%p1341_p2)  }
 0x1d3   : > { %s1345_s7 = scalar_lea.vmem %s441_s6, 16  ;;  %p1352_p8 = scmp.lt.s32.totalorder %s441_s6, %s1645_s12 }
 0x1d4   : > { %p1346_p5 = scmp.ne.s32.totalorder %s441_s6, %s1345_s7  ;;  %p1353_p1 = scmp.lt.s32.totalorder %s1676_s10, %s1345_s7 }
 0x1d6   : > { %p1347_p0 = pnand %p1346_p5, %p2236_p4  ;;  %p1354_p12 = por %p1353_p1, %p1352_p8 }
 0x1d8   : > { %p1348_p7 = pneg %p1347_p0 }
 0x1da   : > { %p1355_p3 = pnand %p1354_p12, %p1348_p7 }
 0x1dc   : > { %1358 = shalt.err (!%p1355_p3)  }
 0x1dd   : > { %849 = dma.hbm_to_vmem [thread:$0]  (%p2236_p4), %s430_s13, 16, %s441_s6, %s1905_s24 }
 0x1de   : > { %s853_s5 = scalar_select %p2236_p4, [#allocation5], [#allocation51] }
 0x1df   : > { %s2315_s15 = smov (!%p2236_p4, %s465_s15), 0  ;;  %p446_p10 = scmp.gt.s32.totalorder %s2073_s21, 0 }
 0x1e0   : > { %p763_p13 = scmp.lt.s32.totalorder %s2073_s21, 63  ;;  %s461_s14 = sshll.u32 %s603_s19, 4  ;;  %s462_s14 = int_to_ptr.vmem [resolvable:$true] %s461_s14 }
 0x1e1   : > { %s2099_s20 = sld [smem:[%s853_s5 + %s2315_s15]]  ;;  %s2317_s21 = smov (!%p446_p10, %s2073_s21), 0 }
 0x1e2   : > { %s2319_s21 = smov (!%p763_p13, %s2317_s21), 63  ;;  %s608_s29 = scalar_lea.vmem %s1887_s28, 7 [#allocation2] }
 0x1e3   : > { %s768_s22 = sshll.u32 %s2319_s21, 4 }
 0x1e4   : > { %s451_s6 = scalar_lea.hbm %s2198_s1, %s768_s22 }
 0x1e5   : > { %s1359_s8 = scalar_lea.hbm %s451_s6, 16  ;;  %p1364_p5 = scmp.lt.u32.totalorder %s451_s6, %s2198_s1 }
 0x1e6   : > { %p1360_p11 = scmp.ne.s32.totalorder %s451_s6, %s1359_s8  ;;  %p1365_p0 = scmp.lt.u32.totalorder %s1665_s11, %s1359_s8 }
 0x1e7   : > { %p1367_p8 = scmp.lt.u32.totalorder %s1359_s8, %s451_s6 }
 0x1e8   : > { %p1361_p9 = pnand %p1360_p11, %p2236_p4  ;;  %p1366_p7 = por %p1365_p0, %p1364_p5 }
 0x1ea   : > { %p1362_p2 = pneg %p1361_p9  ;;  %p1368_p1 = por %p1367_p8, %p1366_p7 }
 0x1ec   : > { %p1369_p12 = pnand %p1368_p1, %p1362_p2 }
 0x1ee   : > { %1372 = shalt.err (!%p1369_p12)  }
 0x1ef   : > { %s1373_s28 = scalar_lea.vmem %s462_s14, 16  ;;  %p1380_p11 = scmp.lt.s32.totalorder %s462_s14, %s1645_s12 }
 0x1f0   : > { %p1374_p3 = scmp.ne.s32.totalorder %s462_s14, %s1373_s28  ;;  %p1381_p9 = scmp.lt.s32.totalorder %s1676_s10, %s1373_s28 }
 0x1f2   : > { %p1375_p10 = pnand %p1374_p3, %p2236_p4  ;;  %p1382_p6 = por %p1381_p9, %p1380_p11 }
 0x1f4   : > { %p1376_p13 = pneg %p1375_p10 }
 0x1f6   : > { %p1383_p0 = pnand %p1382_p6, %p1376_p13 }
 0x1f8   : > { %1386 = shalt.err (!%p1383_p0)  }
 0x1f9   : > { %852 = dma.hbm_to_vmem [thread:$0]  (%p2236_p4), %s451_s6, 16, %s462_s14, %s1905_s24 }
 0x1fa   : > { %p2239_p2 = scmp.gt.s32.totalorder %s2099_s20, 0  ;;  %p770_p5 = scmp.lt.s32.totalorder %s2099_s20, 63 }
 0x1fb   : > { %s482_s15 = sshll.u32 %s608_s29, 4  ;;  %s483_s15 = int_to_ptr.vmem [resolvable:$true] %s482_s15 }
 0x1fc   : > { %s468_s21 = scalar_select %p2239_p2, %s2099_s20, 0 }
 0x1fe   : > { %s2321_s21 = smov (!%p770_p5, %s468_s21), 63 }
 0x1ff   : > { %s775_s26 = sshll.u32 %s2321_s21, 4 }
 0x200   : > { %s472_s7 = scalar_lea.hbm %s2198_s1, %s775_s26 }
 0x201   : > { %s1387_s5 = scalar_lea.hbm %s472_s7, 16  ;;  %p1392_p1 = scmp.lt.u32.totalorder %s472_s7, %s2198_s1 }
 0x202   : > { %p1388_p6 = scmp.ne.s32.totalorder %s472_s7, %s1387_s5  ;;  %p1393_p12 = scmp.lt.u32.totalorder %s1665_s11, %s1387_s5 }
 0x203   : > { %p1395_p10 = scmp.lt.u32.totalorder %s1387_s5, %s472_s7 }
 0x204   : > { %p1389_p7 = pnand %p1388_p6, %p2236_p4  ;;  %p1394_p3 = por %p1393_p12, %p1392_p1 }
 0x206   : > { %p1390_p8 = pneg %p1389_p7  ;;  %p1396_p13 = por %p1395_p10, %p1394_p3 }
 0x208   : > { %p1397_p11 = pnand %p1396_p13, %p1390_p8 }
 0x20a   : > { %1400 = shalt.err (!%p1397_p11)  }
 0x20b   : > { %s1401_s14 = scalar_lea.vmem %s483_s15, 16  ;;  %p1408_p5 = scmp.lt.s32.totalorder %s483_s15, %s1645_s12 }
 0x20c   : > { %p1402_p9 = scmp.ne.s32.totalorder %s483_s15, %s1401_s14  ;;  %p1409_p6 = scmp.lt.s32.totalorder %s1676_s10, %s1401_s14 }
 0x20e   : > { %p1403_p0 = pnand %p1402_p9, %p2236_p4  ;;  %p1410_p7 = por %p1409_p6, %p1408_p5 }
 0x210   : > { %p1404_p2 = pneg %p1403_p0 }
 0x212   : > { %p1411_p1 = pnand %p1410_p7, %p1404_p2 }
 0x214   : > { %1414 = shalt.err (!%p1411_p1)  }
 0x215   : > { %855 = dma.hbm_to_vmem [thread:$0]  (%p2236_p4), %s472_s7, 16, %s483_s15, %s1905_s24 }
 0x216   : > { %s134_s11 = scalar_lea.vmem [#allocation9], %s1642_s30  ;;  %s2240_s20 = sshll.u32 %s2281_s2, 3 }
 0x217   : > { %s487_s29 = scalar_lea.vmem [#allocation2], %s2240_s20  ;;  %s488_s0 = scalar_lea.sflag [#allocation3], %s2281_s2 }
 0x218   : > { %1473 = dma.done.wait %s488_s0, 128 }
 0x219   : > { %1474 = vsyncadd %s488_s0, 4294967168  ;;  %s779_s12 = sshll.u32 %s1493_s25, 7  ;;  %s511_s10 = sshll.u32 %s134_s11, 4  ;;  %v492_v0 = vld [vmem:[%s487_s29] sm:$0xff]  ;;  %v493_v1 = vld [vmem:[#allocation6] sm:$0xff]  ;;  %s2150_s10 = int_to_ptr.vmem [resolvable:$true] %s511_s10 }
 0x21a   : > { %v494_v2 = vadd.f32 %v493_v1, %v492_v0  ;;  %s2148_s8 = scalar_lea.hbm %s2200_s3, %s779_s12  ;;  %s2241_s24 = sand.u32 1, %s1485_s23  }
 0x21b   : > { %s497_s30 = scalar_lea.sflag [#allocation8], %s2241_s24  ;;  %s1415_s2 = scalar_lea.vmem %s2150_s10, 128 }
 0x21c   : > { %495 = vst [vmem:[%s134_s11] sm:$0xff] %v494_v2  ;;  %p1416_p4 = scmp.ne.s32.totalorder %s2150_s10, %s1415_s2  ;;  %p2242_p8 = scmp.ne.s32.totalorder %s2217_s4, 0 }
 0x21d   : > { %s1513_s25 = smov [#allocation9]  }
 0x21e   : > { %p1417_p12 = pnand %p1416_p4, %p2242_p8  ;;  %s1419_s13 = sshll.u32 %s1513_s25, 4  ;;  %s1420_s13 = int_to_ptr.vmem [resolvable:$false] %s1419_s13 }
 0x21f   : > { %s1421_s19 = scalar_lea.vmem %s1420_s13, 256  ;;  %p1422_p10 = scmp.lt.s32.totalorder %s2150_s10, %s1420_s13 }
 0x220   : > { %p1418_p3 = pneg %p1417_p12  ;;  %p1423_p13 = scmp.lt.s32.totalorder %s1421_s19, %s1415_s2 }
 0x222   : > { %p1424_p11 = por %p1423_p13, %p1422_p10 }
 0x224   : > { %p1425_p9 = pnand %p1424_p11, %p1418_p3 }
 0x226   : > { %1428 = shalt.err (!%p1425_p9)
}
 0x227   : > { %s1429_s28 = scalar_lea.hbm %s2148_s8, 128  ;;  %s1433_s26 = scalar_lea.hbm %s2200_s3, 256 }
 0x228   : > { %p1430_p0 = scmp.ne.s32.totalorder %s2148_s8, %s1429_s28  ;;  %p1434_p6 = scmp.lt.u32.totalorder %s2148_s8, %s2200_s3 }
 0x229   : > { %p1435_p7 = scmp.lt.u32.totalorder %s1433_s26, %s1429_s28  ;;  %p1437_p4 = scmp.lt.u32.totalorder %s1429_s28, %s2148_s8 }
 0x22a   : > { %p1431_p2 = pnand %p1430_p0, %p2242_p8 }
 0x22b   : > { %p1436_p1 = por %p1435_p7, %p1434_p6 }
 0x22c   : > { %p1432_p5 = pneg %p1431_p2 }
 0x22d   : > { %p1438_p12 = por %p1437_p4, %p1436_p1 }
 0x22f   : > { %p1439_p3 = pnand %p1438_p12, %p1432_p5 }
 0x231   : > { %1442 = shalt.err (!%p1439_p3)
}
 0x232   : > { %856 = dma.vmem_to_hbm [thread:$0]  (%p2242_p8), %s2150_s10, 128, %s2148_s8, %s497_s30  }
 0x233 PF: > { %s2243_s7 = sld [smem:[#allocation56_spill]]  ;;  %s2244_s5 = sld [smem:[#allocation60_spill]] }
 0x234   : > { %p870_p10 = scmp.ge.s32.totalorder %s1501_s27, 2 }
 0x239   : > { %s523_s22 = sand.u32 1, %s2243_s7   ;;  %p2245_p13 = scmp.ne.s32.totalorder %s2244_s5, 0 }
 0x23a   : > { %s524_s18 = scalar_lea.sflag [#allocation8], %s523_s22 }
 0x23b   : > { %p863_p11 = pnand %p870_p10, %p2245_p13 }
 0x23d   : > { %1476 = dma.done.wait (!%p863_p11), %s524_s18, 128  }
 0x23e   : > { %1478 = vsyncadd (!%p863_p11), %s524_s18, 4294967168  ;;  %s21_s27 = sadd.s32 1, %s1501_s27   ;;  %s2246_s14 = sld [smem:[#allocation57_spill]] }
 0x23f   : > { %p18_p9 = scmp.ge.s32.totalorder %s21_s27, 4   ;;  %s2247_s24 = sld [smem:[#allocation61_spill]] }
 0x240   : > { %s2248_s25 = sld [smem:[#allocation58_spill]]  ;;  %s2249_s26 = sld [smem:[#allocation59_spill]] }
 0x241   : > { %s2250_s22 = smov %s1485_s23  ;;  %20 = sbr.rel (!%p18_p9) target bundleno = 17 (0x11), region = 169 }
 0x244   : > { %s2251_s23 = smov %s2246_s14 }
 0x248   :  { %529 = vsyncpa [#allocation7], 1 }
 0x249   :  { %531 = vsyncpa [#allocation7 + $0x1], 1 }
 0x24a   :  { %532 = vsyncpa [#allocation8], 1 }
 0x24b   :  { %534 = vsyncpa [#allocation8 + $0x1], 1 }
 0x24c   :  { %535 = vsyncmov [#allocation3] }
 0x24f   :  { %s536_s4 = vpop.sfrf %535 }
 0x250   :  { %p782_p8 = scmp.ne.s32.totalorder %s536_s4, 0 }
 0x252   :  { %540 = shalt.err (%p782_p8)  }
 0x253   :  { %542 = vsyncmov [#allocation3 + $0x1] }
 0x256   :  { %s543_s11 = vpop.sfrf %542 }
 0x257   :  { %p783_p0 = scmp.ne.s32.totalorder %s543_s11, 0 }
 0x259   :  { %547 = shalt.err (%p783_p0)  }

</bundles_post_ra>
